<compile_context>
chip_gen: v7x
topology: tpu7x:2x2x1
jax: 0.10.0
libtpu: 0.0.40
codegen_flags: <defaults>
</compile_context>

<pallas_src>
import functools

import jax
import jax.numpy as jnp
import numpy as np
from jax.experimental import pallas as pl
from jax.experimental.pallas import tpu as pltpu


# ----------------------------------------------------------------------------
# Pallas kernel: full Set2Set forward for one tile of TB graphs
# ----------------------------------------------------------------------------
def set2set_kernel(
    batch_ref,   # [1, Np]     int32 graph id per node (-1 for padded nodes)
    x_ref,       # [Np, Cp]    node features (bf16 or f32, zero-padded)
    w_ref,       # [2Cp, 4Cp]  fused GRU weights, column groups [r | z | gi_n | gh_n]
    b_ref,       # [1, 4Cp]    fused GRU biases
    out_ref,     # [TB, 2Cp]   q_star = [q | r] for this graph tile
    qstar_scr,   # [TB, 2Cp]   VMEM scratch carrying q_star across steps
    *, processing_steps: int,
):
    tb = qstar_scr.shape[0]
    cp = qstar_scr.shape[1] // 2
    n_nodes = batch_ref.shape[1]
    tile = pl.program_id(0)

    attn_dt = x_ref.dtype
    x = x_ref[...]                                       # [Np, Cp]
    w = w_ref[...]                                       # [2Cp, 4Cp]
    bvec = jnp.broadcast_to(b_ref[...], (tb, 4 * cp))    # hoisted bias broadcast

    # Loop-invariant additive softmax mask bias (0 for own-graph nodes, -1e30
    # elsewhere), rebuilt from the int32 graph-id vector -- no dense [B, N]
    # membership matrix and no per-step select/multiply.
    row_gid = jax.lax.broadcasted_iota(jnp.int32, (tb, n_nodes), 0) + tile * tb
    mask = row_gid == batch_ref[...]                     # [TB, Np] bool
    logit_bias = jnp.where(mask, 0.0, -1e30).astype(jnp.float32)

    qstar_scr[...] = jnp.zeros_like(qstar_scr)

    # processing_steps is small and static -> unrolled Python loop.
    for _ in range(processing_steps):
        qstar = qstar_scr[...]                           # [TB, 2Cp]
        h = qstar[:, :cp]                                # q half == GRU hidden

        # --- fused single-layer GRU cell (PyTorch gate order r, z, n) -------
        g = jnp.dot(qstar, w, preferred_element_type=jnp.float32) + bvec
        r_g = jax.nn.sigmoid(g[:, :cp])
        z_g = jax.nn.sigmoid(g[:, cp:2 * cp])
        n_g = jnp.tanh(g[:, 2 * cp:3 * cp] + r_g * g[:, 3 * cp:])
        h_new = (1.0 - z_g) * n_g + z_g * h              # q == h_new

        # --- attention readout: segment softmax + weighted sum --------------
        # Contract on the channel axis directly (no x^T operand needed).
        logits = jax.lax.dot_general(
            h_new.astype(attn_dt), x,
            dimension_numbers=(((1,), (1,)), ((), ())),
            preferred_element_type=jnp.float32)          # [TB, Np]
        masked = logits + logit_bias
        row_max = jnp.max(masked, axis=-1, keepdims=True)
        ex = jnp.exp(masked - row_max)                   # masked-out cols underflow to 0
        denom = jnp.sum(ex, axis=-1, keepdims=True)
        a = ex / (denom + jnp.float32(1e-16))            # [TB, Np]
        r_new = jnp.dot(a.astype(attn_dt), x,
                        preferred_element_type=jnp.float32)   # [TB, Cp]

        qstar_scr[:, :cp] = h_new
        qstar_scr[:, cp:] = r_new

    out_ref[...] = qstar_scr[...]


# ----------------------------------------------------------------------------
# Wrapper
# ----------------------------------------------------------------------------
def _round_up(v, m):
    return ((v + m - 1) // m) * m


def set2set_gru_pallas(x, batch, params, batch_size, processing_steps,
                       num_layers=1, attn_dtype=jnp.bfloat16):
    assert num_layers == 1  # TODO(synk): stacked (num_layers > 1) GRU not implemented
    N, C = x.shape
    B = int(batch_size)
    w_ih, w_hh, b_ih, b_hh = params      # [3C, 2C], [3C, C], [3C], [3C]

    f32 = jnp.float32
    LANE = 128
    Cp = _round_up(C, LANE)              # padded channel dim (lane-dense)
    Np = _round_up(N, LANE)              # padded node dim

    # ---- generation-aware VMEM budget ---------------------------------------
    try:
        hw_vmem = int(pltpu.get_tpu_info().vmem_capacity_bytes)
    except Exception:
        hw_vmem = 64 * 1024 * 1024       # conservative: valid on v5e/v6e/v7x
    vmem_budget = max(16 * 1024 * 1024, hw_vmem - 16 * 1024 * 1024)

    attn_bytes = jnp.dtype(attn_dtype).itemsize
    resident_bytes = (Np * Cp * attn_bytes          # x (single-buffered)
                      + Np * 4                      # batch ids
                      + (2 * Cp) * (4 * Cp) * 4     # fused weights
                      + (4 * Cp) * 4)               # fused bias

    def _per_tile_bytes(tb):
        # q_star scratch + 2x output buffers + [tb, Np] softmax intermediates
        # + [tb, 4Cp] gate tensor & friends (rough, f32)
        return 4 * (3 * tb * 2 * Cp + 5 * tb * Np + 4 * tb * 4 * Cp)

    # Tile height: up to 256 graphs (MXU row count on v6e/v7x), shrunk only if
    # the [TB, Np] intermediates would blow the per-chip VMEM budget.
    TB = _round_up(min(B, 256), 8)
    while TB > 8 and resident_bytes + _per_tile_bytes(TB) > vmem_budget:
        TB = max(8, _round_up(TB // 2, 8))

    Bp = _round_up(B, TB)
    n_tiles = Bp // TB

    est_bytes = resident_bytes + _per_tile_bytes(TB)
    vmem_limit = int(min(vmem_budget, max(32 * 1024 * 1024, 2 * est_bytes)))

    # ---- zero-padded operands (layout plumbing in plain XLA) ----------------
    xp = jnp.zeros((Np, Cp), attn_dtype).at[:N, :C].set(x.astype(attn_dtype))
    bids = jnp.full((1, Np), -1, jnp.int32).at[0, :N].set(batch.astype(jnp.int32))

    # ---- fused GRU weights / biases -----------------------------------------
    # PyTorch GRU: gi = q_star @ W_ih^T + b_ih, gh = h @ W_hh^T + b_hh, gates r,z,n.
    # Since the q half of q_star IS h, the r/z-gate weights acting on q and the
    # hidden weights can be pre-summed; only the n gate keeps input/hidden apart.
    wi_t = w_ih.astype(f32).T            # [2C, 3C]
    wh_t = w_hh.astype(f32).T            # [C, 3C]
    wi_q, wi_r = wi_t[:C], wi_t[C:2 * C]
    b_ih = b_ih.astype(f32)
    b_hh = b_hh.astype(f32)

    w_fused = jnp.zeros((2 * Cp, 4 * Cp), f32)
    # rows acting on the q (hidden) half of q_star
    w_fused = w_fused.at[:C, 0:C].set(wi_q[:, 0:C] + wh_t[:, 0:C])                   # r
    w_fused = w_fused.at[:C, Cp:Cp + C].set(wi_q[:, C:2 * C] + wh_t[:, C:2 * C])     # z
    w_fused = w_fused.at[:C, 2 * Cp:2 * Cp + C].set(wi_q[:, 2 * C:3 * C])            # gi_n
    w_fused = w_fused.at[:C, 3 * Cp:3 * Cp + C].set(wh_t[:, 2 * C:3 * C])            # gh_n
    # rows acting on the r (readout) half of q_star
    w_fused = w_fused.at[Cp:Cp + C, 0:C].set(wi_r[:, 0:C])
    w_fused = w_fused.at[Cp:Cp + C, Cp:Cp + C].set(wi_r[:, C:2 * C])
    w_fused = w_fused.at[Cp:Cp + C, 2 * Cp:2 * Cp + C].set(wi_r[:, 2 * C:3 * C])

    b_fused = jnp.zeros((1, 4 * Cp), f32)
    b_fused = b_fused.at[0, 0:C].set(b_ih[:C] + b_hh[:C])                 # r gate
    b_fused = b_fused.at[0, Cp:Cp + C].set(b_ih[C:2 * C] + b_hh[C:2 * C]) # z gate
    b_fused = b_fused.at[0, 2 * Cp:2 * Cp + C].set(b_ih[2 * C:])          # n gate (input)
    b_fused = b_fused.at[0, 3 * Cp:3 * Cp + C].set(b_hh[2 * C:])          # n gate (hidden)

    kernel = functools.partial(set2set_kernel, processing_steps=processing_steps)

    # Loop-invariant inputs are single-buffered (constant index_map -> double
    # buffering buys no overlap but doubles the resident footprint).
    invariant = dict(pipeline_mode=pl.Buffered(1))

    out = pl.pallas_call(
        kernel,
        out_shape=jax.ShapeDtypeStruct((Bp, 2 * Cp), f32),
        grid=(n_tiles,),
        in_specs=[
            pl.BlockSpec((1, Np), lambda i: (0, 0), **invariant),          # batch ids
            pl.BlockSpec((Np, Cp), lambda i: (0, 0), **invariant),         # x
            pl.BlockSpec((2 * Cp, 4 * Cp), lambda i: (0, 0), **invariant), # fused W
            pl.BlockSpec((1, 4 * Cp), lambda i: (0, 0), **invariant),      # fused bias
        ],
        out_specs=pl.BlockSpec((TB, 2 * Cp), lambda i: (i, 0)),
        scratch_shapes=[pltpu.VMEM((TB, 2 * Cp), f32)],
        compiler_params=pltpu.CompilerParams(
            dimension_semantics=("parallel",),
            vmem_limit_bytes=vmem_limit,
        ),
    )(bids, xp, w_fused, b_fused)

    # q_star = [q, r] per graph, sliced back to the unpadded shape.  Padded
    # graph rows (>= B) contain junk (uniform softmax) and are dropped here.
    q = out[:B, :C]
    r = out[:B, Cp:Cp + C]
    return jnp.concatenate([q, r], axis=-1)


# ----------------------------------------------------------------------------
# Pure-JAX reference (segment ops, mirrors torch_geometric semantics)
# ----------------------------------------------------------------------------
def set2set_gru_ref(x, batch, params, batch_size, processing_steps):
    N, C = x.shape
    B = batch_size
    w_ih, w_hh, b_ih, b_hh = params
    h = jnp.zeros((B, C), jnp.float32)
    q_star = jnp.zeros((B, 2 * C), jnp.float32)
    for _ in range(processing_steps):
        gi = q_star @ w_ih.T + b_ih
        gh = h @ w_hh.T + b_hh
        r_g = jax.nn.sigmoid(gi[:, :C] + gh[:, :C])
        z_g = jax.nn.sigmoid(gi[:, C:2 * C] + gh[:, C:2 * C])
        n_g = jnp.tanh(gi[:, 2 * C:] + r_g * gh[:, 2 * C:])
        h = (1.0 - z_g) * n_g + z_g * h
        q = h
        e = jnp.sum(x * q[batch], axis=-1)                               # [N]
        e_max = jax.ops.segment_max(e, batch, num_segments=B)
        a = jnp.exp(e - e_max[batch])
        denom = jax.ops.segment_sum(a, batch, num_segments=B)
        a = a / (denom[batch] + 1e-16)
        r = jax.ops.segment_sum(a[:, None] * x, batch, num_segments=B)   # [B, C]
        q_star = jnp.concatenate([q, r], axis=-1)
    return q_star


# ----------------------------------------------------------------------------
if __name__ == "__main__":
    in_channels = 32
    processing_steps = 3
    num_layers = 1
    B = 4                     # number of graphs in the batch
    nodes_per_graph = 8
    N = B * nodes_per_graph   # total nodes

    key = jax.random.PRNGKey(0)
    k_x, k_wih, k_whh, k_bih, k_bhh = jax.random.split(key, 5)

    x = jax.random.normal(k_x, (N, in_channels), dtype=jnp.float32)
    batch = jnp.repeat(jnp.arange(B, dtype=jnp.int32), nodes_per_graph)

    # GRU parameter init (PyTorch-style uniform(-1/sqrt(H), 1/sqrt(H))), deterministic.
    H = in_channels
    I = 2 * in_channels
    bound = 1.0 / np.sqrt(H)
    w_ih = jax.random.uniform(k_wih, (3 * H, I), jnp.float32, -bound, bound)
    w_hh = jax.random.uniform(k_whh, (3 * H, H), jnp.float32, -bound, bound)
    b_ih = jax.random.uniform(k_bih, (3 * H,), jnp.float32, -bound, bound)
    b_hh = jax.random.uniform(k_bhh, (3 * H,), jnp.float32, -bound, bound)
    params = (w_ih, w_hh, b_ih, b_hh)

    ref = set2set_gru_ref(x, batch, params, B, processing_steps)

    # 1) f32 attention path: exact-precision check against the f32 reference.
    out_f32 = set2set_gru_pallas(x, batch, params, B, processing_steps,
                                 num_layers, attn_dtype=jnp.float32)
    out_f32 = jax.block_until_ready(out_f32)
    np.testing.assert_allclose(np.asarray(out_f32), np.asarray(ref),
                               rtol=1e-4, atol=1e-4)

    # 2) default bf16 attention path (perf config): bf16 operands with f32
    #    accumulation -> looser tolerance.
    out_bf16 = set2set_gru_pallas(x, batch, params, B, processing_steps, num_layers)
    out_bf16 = jax.block_until_ready(out_bf16)
    np.testing.assert_allclose(np.asarray(out_bf16), np.asarray(ref),
                               rtol=3e-2, atol=3e-2)

    print("KERNEL_OK")
</pallas_src>

<mosaic_0001>
module attributes {stable_mosaic.version = 11 : i64} {
  func.func @set2set_kernel(%arg0: i32, %arg1: memref<1x128xi32, #tpu.memory_space<vmem>>, %arg2: memref<128x128xf32, #tpu.memory_space<vmem>>, %arg3: memref<256x512xf32, #tpu.memory_space<vmem>>, %arg4: memref<1x512xf32, #tpu.memory_space<vmem>>, %arg5: memref<8x256xf32, #tpu.memory_space<vmem>>, %arg6: memref<8x256xf32, #tpu.memory_space<vmem>>) attributes {dimension_semantics = [#tpu.dimension_semantics<parallel>], iteration_bounds = array<i64: 1>, scalar_prefetch = 0 : i64, scratch_operands = 1 : i64, tpu.core_type = #tpu.core_type<tc>, window_params = [{pipeline_mode = #tpu.pipeline_mode<synchronous>, transform_indices = @transform_0, window_bounds = array<i64: 1, 128>}, {pipeline_mode = #tpu.pipeline_mode<synchronous>, transform_indices = @transform_1, window_bounds = array<i64: 128, 128>}, {pipeline_mode = #tpu.pipeline_mode<synchronous>, transform_indices = @transform_2, window_bounds = array<i64: 256, 512>}, {pipeline_mode = #tpu.pipeline_mode<synchronous>, transform_indices = @transform_3, window_bounds = array<i64: 1, 512>}, {transform_indices = @transform_4, window_bounds = array<i64: 8, 256>}]} {
    %c0 = arith.constant 0 : index
    %c0_0 = arith.constant 0 : index
    %0 = vector.load %arg2[%c0, %c0_0] : memref<128x128xf32, #tpu.memory_space<vmem>>, vector<128x128xf32>
    %c0_1 = arith.constant 0 : index
    %c0_2 = arith.constant 0 : index
    %1 = vector.load %arg3[%c0_1, %c0_2] : memref<256x512xf32, #tpu.memory_space<vmem>>, vector<256x512xf32>
    %c0_3 = arith.constant 0 : index
    %c0_4 = arith.constant 0 : index
    %2 = vector.load %arg4[%c0_3, %c0_4] : memref<1x512xf32, #tpu.memory_space<vmem>>, vector<1x512xf32>
    %3 = vector.shape_cast %2 : vector<1x512xf32> to vector<1x512xf32>
    %4 = vector.broadcast %3 : vector<1x512xf32> to vector<8x512xf32>
    %5 = tpu.iota {dimensions = array<i32: 0>} : vector<8x128xi32>
    %c8_i32 = arith.constant 8 : i32
    %6 = arith.muli %arg0, %c8_i32 : i32
    %7 = vector.broadcast %6 : i32 to vector<8x128xi32>
    %8 = arith.addi %5, %7 : vector<8x128xi32>
    %c0_5 = arith.constant 0 : index
    %c0_6 = arith.constant 0 : index
    %9 = vector.load %arg1[%c0_5, %c0_6] : memref<1x128xi32, #tpu.memory_space<vmem>>, vector<1x128xi32>
    %10 = vector.broadcast %9 : vector<1x128xi32> to vector<8x128xi32>
    %11 = arith.cmpi eq, %8, %10 : vector<8x128xi32>
    %cst = arith.constant 0.000000e+00 : f32
    %cst_7 = arith.constant -1.000000e+30 : f32
    %12 = vector.broadcast %cst : f32 to vector<8x128xf32>
    %13 = vector.broadcast %cst_7 : f32 to vector<8x128xf32>
    %14 = arith.select %11, %12, %13 : vector<8x128xi1>, vector<8x128xf32>
    %cst_8 = arith.constant 0.000000e+00 : f32
    %15 = vector.broadcast %cst_8 : f32 to vector<8x256xf32>
    %c0_9 = arith.constant 0 : index
    %c0_10 = arith.constant 0 : index
    %16 = vector.load %arg6[%c0_9, %c0_10] : memref<8x256xf32, #tpu.memory_space<vmem>>, vector<8x256xf32>
    tpu.vector_store %arg6[%c0_9, %c0_10], %15 {strides = array<i32>} : memref<8x256xf32, #tpu.memory_space<vmem>>, vector<8x256xf32>,
    %c0_11 = arith.constant 0 : index
    %c0_12 = arith.constant 0 : index
    %17 = vector.load %arg6[%c0_11, %c0_12] : memref<8x256xf32, #tpu.memory_space<vmem>>, vector<8x256xf32>
    %18 = vector.extract_strided_slice %17 {offsets = [0, 0], sizes = [8, 128], strides = [1, 1]} : vector<8x256xf32> to vector<8x128xf32>
    %cst_13 = arith.constant dense<0.000000e+00> : vector<8x512xf32>
    %19 = tpu.matmul %17, %1, %cst_13 {dimension_numbers = #tpu.dot_dimension_numbers<[1], [0], [0], [1], [0, 0, 1, 1], [], []>} : vector<8x256xf32>, vector<256x512xf32>, vector<8x512xf32> -> vector<8x512xf32>
    %20 = arith.addf %19, %4 : vector<8x512xf32>
    %21 = vector.extract_strided_slice %20 {offsets = [0, 0], sizes = [8, 128], strides = [1, 1]} : vector<8x512xf32> to vector<8x128xf32>
    %22 = arith.negf %21 : vector<8x128xf32>
    %23 = math.exp %22 : vector<8x128xf32>
    %cst_14 = arith.constant 1.000000e+00 : f32
    %24 = vector.broadcast %cst_14 : f32 to vector<8x128xf32>
    %25 = arith.addf %24, %23 : vector<8x128xf32>
    %26 = arith.divf %24, %25 : vector<8x128xf32>
    %27 = vector.extract_strided_slice %20 {offsets = [0, 128], sizes = [8, 128], strides = [1, 1]} : vector<8x512xf32> to vector<8x128xf32>
    %28 = arith.negf %27 : vector<8x128xf32>
    %29 = math.exp %28 : vector<8x128xf32>
    %cst_15 = arith.constant 1.000000e+00 : f32
    %30 = vector.broadcast %cst_15 : f32 to vector<8x128xf32>
    %31 = arith.addf %30, %29 : vector<8x128xf32>
    %32 = arith.divf %30, %31 : vector<8x128xf32>
    %33 = vector.extract_strided_slice %20 {offsets = [0, 256], sizes = [8, 128], strides = [1, 1]} : vector<8x512xf32> to vector<8x128xf32>
    %34 = vector.extract_strided_slice %20 {offsets = [0, 384], sizes = [8, 128], strides = [1, 1]} : vector<8x512xf32> to vector<8x128xf32>
    %35 = arith.mulf %26, %34 : vector<8x128xf32>
    %36 = arith.addf %33, %35 : vector<8x128xf32>
    %37 = math.tanh %36 : vector<8x128xf32>
    %cst_16 = arith.constant 1.000000e+00 : f32
    %38 = vector.broadcast %cst_16 : f32 to vector<8x128xf32>
    %39 = arith.subf %38, %32 : vector<8x128xf32>
    %40 = arith.mulf %39, %37 : vector<8x128xf32>
    %41 = arith.mulf %32, %18 : vector<8x128xf32>
    %42 = arith.addf %40, %41 : vector<8x128xf32>
    %cst_17 = arith.constant dense<0.000000e+00> : vector<8x128xf32>
    %43 = tpu.matmul %42, %0, %cst_17 {dimension_numbers = #tpu.dot_dimension_numbers<[1], [1], [0], [0], [0, 0, 1, 0], [], []>} : vector<8x128xf32>, vector<128x128xf32>, vector<8x128xf32> -> vector<8x128xf32>
    %44 = arith.addf %43, %14 : vector<8x128xf32>
    %cst_18 = arith.constant dense<0xFF800000> : vector<8xf32>
    %45 = vector.multi_reduction <maximumf>, %44, %cst_18 [1] : vector<8x128xf32> to vector<8xf32>
    %46 = vector.shape_cast %45 : vector<8xf32> to vector<8x1xf32>
    %47 = vector.broadcast %46 : vector<8x1xf32> to vector<8x128xf32>
    %48 = arith.subf %44, %47 : vector<8x128xf32>
    %49 = math.exp %48 : vector<8x128xf32>
    %cst_19 = arith.constant dense<0.000000e+00> : vector<8xf32>
    %50 = vector.multi_reduction <add>, %49, %cst_19 [1] : vector<8x128xf32> to vector<8xf32>
    %51 = vector.shape_cast %50 : vector<8xf32> to vector<8x1xf32>
    %cst_20 = arith.constant 1.000000e-16 : f32
    %52 = vector.broadcast %cst_20 : f32 to vector<8x1xf32>
    %53 = arith.addf %51, %52 : vector<8x1xf32>
    %54 = vector.broadcast %53 : vector<8x1xf32> to vector<8x128xf32>
    %55 = arith.divf %49, %54 : vector<8x128xf32>
    %cst_21 = arith.constant dense<0.000000e+00> : vector<8x128xf32>
    %56 = tpu.matmul %55, %0, %cst_21 {dimension_numbers = #tpu.dot_dimension_numbers<[1], [0], [0], [1], [0, 0, 1, 1], [], []>} : vector<8x128xf32>, vector<128x128xf32>, vector<8x128xf32> -> vector<8x128xf32>
    %c0_22 = arith.constant 0 : index
    %c0_23 = arith.constant 0 : index
    %57 = vector.load %arg6[%c0_22, %c0_23] : memref<8x256xf32, #tpu.memory_space<vmem>>, vector<8x128xf32>
    tpu.vector_store %arg6[%c0_22, %c0_23], %42 {strides = array<i32>} : memref<8x256xf32, #tpu.memory_space<vmem>>, vector<8x128xf32>,
    %c0_24 = arith.constant 0 : index
    %c128 = arith.constant 128 : index
    %58 = vector.load %arg6[%c0_24, %c128] : memref<8x256xf32, #tpu.memory_space<vmem>>, vector<8x128xf32>
    tpu.vector_store %arg6[%c0_24, %c128], %56 {strides = array<i32>} : memref<8x256xf32, #tpu.memory_space<vmem>>, vector<8x128xf32>,
    %c0_25 = arith.constant 0 : index
    %c0_26 = arith.constant 0 : index
    %59 = vector.load %arg6[%c0_25, %c0_26] : memref<8x256xf32, #tpu.memory_space<vmem>>, vector<8x256xf32>
    %60 = vector.extract_strided_slice %59 {offsets = [0, 0], sizes = [8, 128], strides = [1, 1]} : vector<8x256xf32> to vector<8x128xf32>
    %cst_27 = arith.constant dense<0.000000e+00> : vector<8x512xf32>
    %61 = tpu.matmul %59, %1, %cst_27 {dimension_numbers = #tpu.dot_dimension_numbers<[1], [0], [0], [1], [0, 0, 1, 1], [], []>} : vector<8x256xf32>, vector<256x512xf32>, vector<8x512xf32> -> vector<8x512xf32>
    %62 = arith.addf %61, %4 : vector<8x512xf32>
    %63 = vector.extract_strided_slice %62 {offsets = [0, 0], sizes = [8, 128], strides = [1, 1]} : vector<8x512xf32> to vector<8x128xf32>
    %64 = arith.negf %63 : vector<8x128xf32>
    %65 = math.exp %64 : vector<8x128xf32>
    %cst_28 = arith.constant 1.000000e+00 : f32
    %66 = vector.broadcast %cst_28 : f32 to vector<8x128xf32>
    %67 = arith.addf %66, %65 : vector<8x128xf32>
    %68 = arith.divf %66, %67 : vector<8x128xf32>
    %69 = vector.extract_strided_slice %62 {offsets = [0, 128], sizes = [8, 128], strides = [1, 1]} : vector<8x512xf32> to vector<8x128xf32>
    %70 = arith.negf %69 : vector<8x128xf32>
    %71 = math.exp %70 : vector<8x128xf32>
    %cst_29 = arith.constant 1.000000e+00 : f32
    %72 = vector.broadcast %cst_29 : f32 to vector<8x128xf32>
    %73 = arith.addf %72, %71 : vector<8x128xf32>
    %74 = arith.divf %72, %73 : vector<8x128xf32>
    %75 = vector.extract_strided_slice %62 {offsets = [0, 256], sizes = [8, 128], strides = [1, 1]} : vector<8x512xf32> to vector<8x128xf32>
    %76 = vector.extract_strided_slice %62 {offsets = [0, 384], sizes = [8, 128], strides = [1, 1]} : vector<8x512xf32> to vector<8x128xf32>
    %77 = arith.mulf %68, %76 : vector<8x128xf32>
    %78 = arith.addf %75, %77 : vector<8x128xf32>
    %79 = math.tanh %78 : vector<8x128xf32>
    %cst_30 = arith.constant 1.000000e+00 : f32
    %80 = vector.broadcast %cst_30 : f32 to vector<8x128xf32>
    %81 = arith.subf %80, %74 : vector<8x128xf32>
    %82 = arith.mulf %81, %79 : vector<8x128xf32>
    %83 = arith.mulf %74, %60 : vector<8x128xf32>
    %84 = arith.addf %82, %83 : vector<8x128xf32>
    %cst_31 = arith.constant dense<0.000000e+00> : vector<8x128xf32>
    %85 = tpu.matmul %84, %0, %cst_31 {dimension_numbers = #tpu.dot_dimension_numbers<[1], [1], [0], [0], [0, 0, 1, 0], [], []>} : vector<8x128xf32>, vector<128x128xf32>, vector<8x128xf32> -> vector<8x128xf32>
    %86 = arith.addf %85, %14 : vector<8x128xf32>
    %cst_32 = arith.constant dense<0xFF800000> : vector<8xf32>
    %87 = vector.multi_reduction <maximumf>, %86, %cst_32 [1] : vector<8x128xf32> to vector<8xf32>
    %88 = vector.shape_cast %87 : vector<8xf32> to vector<8x1xf32>
    %89 = vector.broadcast %88 : vector<8x1xf32> to vector<8x128xf32>
    %90 = arith.subf %86, %89 : vector<8x128xf32>
    %91 = math.exp %90 : vector<8x128xf32>
    %cst_33 = arith.constant dense<0.000000e+00> : vector<8xf32>
    %92 = vector.multi_reduction <add>, %91, %cst_33 [1] : vector<8x128xf32> to vector<8xf32>
    %93 = vector.shape_cast %92 : vector<8xf32> to vector<8x1xf32>
    %cst_34 = arith.constant 1.000000e-16 : f32
    %94 = vector.broadcast %cst_34 : f32 to vector<8x1xf32>
    %95 = arith.addf %93, %94 : vector<8x1xf32>
    %96 = vector.broadcast %95 : vector<8x1xf32> to vector<8x128xf32>
    %97 = arith.divf %91, %96 : vector<8x128xf32>
    %cst_35 = arith.constant dense<0.000000e+00> : vector<8x128xf32>
    %98 = tpu.matmul %97, %0, %cst_35 {dimension_numbers = #tpu.dot_dimension_numbers<[1], [0], [0], [1], [0, 0, 1, 1], [], []>} : vector<8x128xf32>, vector<128x128xf32>, vector<8x128xf32> -> vector<8x128xf32>
    %c0_36 = arith.constant 0 : index
    %c0_37 = arith.constant 0 : index
    %99 = vector.load %arg6[%c0_36, %c0_37] : memref<8x256xf32, #tpu.memory_space<vmem>>, vector<8x128xf32>
    tpu.vector_store %arg6[%c0_36, %c0_37], %84 {strides = array<i32>} : memref<8x256xf32, #tpu.memory_space<vmem>>, vector<8x128xf32>,
    %c0_38 = arith.constant 0 : index
    %c128_39 = arith.constant 128 : index
    %100 = vector.load %arg6[%c0_38, %c128_39] : memref<8x256xf32, #tpu.memory_space<vmem>>, vector<8x128xf32>
    tpu.vector_store %arg6[%c0_38, %c128_39], %98 {strides = array<i32>} : memref<8x256xf32, #tpu.memory_space<vmem>>, vector<8x128xf32>,
    %c0_40 = arith.constant 0 : index
    %c0_41 = arith.constant 0 : index
    %101 = vector.load %arg6[%c0_40, %c0_41] : memref<8x256xf32, #tpu.memory_space<vmem>>, vector<8x256xf32>
    %102 = vector.extract_strided_slice %101 {offsets = [0, 0], sizes = [8, 128], strides = [1, 1]} : vector<8x256xf32> to vector<8x128xf32>
    %cst_42 = arith.constant dense<0.000000e+00> : vector<8x512xf32>
    %103 = tpu.matmul %101, %1, %cst_42 {dimension_numbers = #tpu.dot_dimension_numbers<[1], [0], [0], [1], [0, 0, 1, 1], [], []>} : vector<8x256xf32>, vector<256x512xf32>, vector<8x512xf32> -> vector<8x512xf32>
    %104 = arith.addf %103, %4 : vector<8x512xf32>
    %105 = vector.extract_strided_slice %104 {offsets = [0, 0], sizes = [8, 128], strides = [1, 1]} : vector<8x512xf32> to vector<8x128xf32>
    %106 = arith.negf %105 : vector<8x128xf32>
    %107 = math.exp %106 : vector<8x128xf32>
    %cst_43 = arith.constant 1.000000e+00 : f32
    %108 = vector.broadcast %cst_43 : f32 to vector<8x128xf32>
    %109 = arith.addf %108, %107 : vector<8x128xf32>
    %110 = arith.divf %108, %109 : vector<8x128xf32>
    %111 = vector.extract_strided_slice %104 {offsets = [0, 128], sizes = [8, 128], strides = [1, 1]} : vector<8x512xf32> to vector<8x128xf32>
    %112 = arith.negf %111 : vector<8x128xf32>
    %113 = math.exp %112 : vector<8x128xf32>
    %cst_44 = arith.constant 1.000000e+00 : f32
    %114 = vector.broadcast %cst_44 : f32 to vector<8x128xf32>
    %115 = arith.addf %114, %113 : vector<8x128xf32>
    %116 = arith.divf %114, %115 : vector<8x128xf32>
    %117 = vector.extract_strided_slice %104 {offsets = [0, 256], sizes = [8, 128], strides = [1, 1]} : vector<8x512xf32> to vector<8x128xf32>
    %118 = vector.extract_strided_slice %104 {offsets = [0, 384], sizes = [8, 128], strides = [1, 1]} : vector<8x512xf32> to vector<8x128xf32>
    %119 = arith.mulf %110, %118 : vector<8x128xf32>
    %120 = arith.addf %117, %119 : vector<8x128xf32>
    %121 = math.tanh %120 : vector<8x128xf32>
    %cst_45 = arith.constant 1.000000e+00 : f32
    %122 = vector.broadcast %cst_45 : f32 to vector<8x128xf32>
    %123 = arith.subf %122, %116 : vector<8x128xf32>
    %124 = arith.mulf %123, %121 : vector<8x128xf32>
    %125 = arith.mulf %116, %102 : vector<8x128xf32>
    %126 = arith.addf %124, %125 : vector<8x128xf32>
    %cst_46 = arith.constant dense<0.000000e+00> : vector<8x128xf32>
    %127 = tpu.matmul %126, %0, %cst_46 {dimension_numbers = #tpu.dot_dimension_numbers<[1], [1], [0], [0], [0, 0, 1, 0], [], []>} : vector<8x128xf32>, vector<128x128xf32>, vector<8x128xf32> -> vector<8x128xf32>
    %128 = arith.addf %127, %14 : vector<8x128xf32>
    %cst_47 = arith.constant dense<0xFF800000> : vector<8xf32>
    %129 = vector.multi_reduction <maximumf>, %128, %cst_47 [1] : vector<8x128xf32> to vector<8xf32>
    %130 = vector.shape_cast %129 : vector<8xf32> to vector<8x1xf32>
    %131 = vector.broadcast %130 : vector<8x1xf32> to vector<8x128xf32>
    %132 = arith.subf %128, %131 : vector<8x128xf32>
    %133 = math.exp %132 : vector<8x128xf32>
    %cst_48 = arith.constant dense<0.000000e+00> : vector<8xf32>
    %134 = vector.multi_reduction <add>, %133, %cst_48 [1] : vector<8x128xf32> to vector<8xf32>
    %135 = vector.shape_cast %134 : vector<8xf32> to vector<8x1xf32>
    %cst_49 = arith.constant 1.000000e-16 : f32
    %136 = vector.broadcast %cst_49 : f32 to vector<8x1xf32>
    %137 = arith.addf %135, %136 : vector<8x1xf32>
    %138 = vector.broadcast %137 : vector<8x1xf32> to vector<8x128xf32>
    %139 = arith.divf %133, %138 : vector<8x128xf32>
    %cst_50 = arith.constant dense<0.000000e+00> : vector<8x128xf32>
    %140 = tpu.matmul %139, %0, %cst_50 {dimension_numbers = #tpu.dot_dimension_numbers<[1], [0], [0], [1], [0, 0, 1, 1], [], []>} : vector<8x128xf32>, vector<128x128xf32>, vector<8x128xf32> -> vector<8x128xf32>
    %c0_51 = arith.constant 0 : index
    %c0_52 = arith.constant 0 : index
    %141 = vector.load %arg6[%c0_51, %c0_52] : memref<8x256xf32, #tpu.memory_space<vmem>>, vector<8x128xf32>
    tpu.vector_store %arg6[%c0_51, %c0_52], %126 {strides = array<i32>} : memref<8x256xf32, #tpu.memory_space<vmem>>, vector<8x128xf32>,
    %c0_53 = arith.constant 0 : index
    %c128_54 = arith.constant 128 : index
    %142 = vector.load %arg6[%c0_53, %c128_54] : memref<8x256xf32, #tpu.memory_space<vmem>>, vector<8x128xf32>
    tpu.vector_store %arg6[%c0_53, %c128_54], %140 {strides = array<i32>} : memref<8x256xf32, #tpu.memory_space<vmem>>, vector<8x128xf32>,
    %c0_55 = arith.constant 0 : index
    %c0_56 = arith.constant 0 : index
    %143 = vector.load %arg6[%c0_55, %c0_56] : memref<8x256xf32, #tpu.memory_space<vmem>>, vector<8x256xf32>
    %c0_57 = arith.constant 0 : index
    %c0_58 = arith.constant 0 : index
    %144 = vector.load %arg5[%c0_57, %c0_58] : memref<8x256xf32, #tpu.memory_space<vmem>>, vector<8x256xf32>
    tpu.vector_store %arg5[%c0_57, %c0_58], %143 {strides = array<i32>} : memref<8x256xf32, #tpu.memory_space<vmem>>, vector<8x256xf32>,
    return
  }
  func.func @transform_0(%arg0: i32) -> (i32, i32) {
    %c0_i32 = arith.constant 0 : i32
    %c0_i32_0 = arith.constant 0 : i32
    %c0_i32_1 = arith.constant 0 : i32
    return %c0_i32, %c0_i32_0 : i32, i32
  }
  func.func @transform_1(%arg0: i32) -> (i32, i32) {
    %c0_i32 = arith.constant 0 : i32
    %c0_i32_0 = arith.constant 0 : i32
    %c0_i32_1 = arith.constant 0 : i32
    return %c0_i32, %c0_i32_0 : i32, i32
  }
  func.func @transform_2(%arg0: i32) -> (i32, i32) {
    %c0_i32 = arith.constant 0 : i32
    %c0_i32_0 = arith.constant 0 : i32
    %c0_i32_1 = arith.constant 0 : i32
    return %c0_i32, %c0_i32_0 : i32, i32
  }
  func.func @transform_3(%arg0: i32) -> (i32, i32) {
    %c0_i32 = arith.constant 0 : i32
    %c0_i32_0 = arith.constant 0 : i32
    %c0_i32_1 = arith.constant 0 : i32
    return %c0_i32, %c0_i32_0 : i32, i32
  }
  func.func @transform_4(%arg0: i32) -> (i32, i32) {
    %c0_i32 = arith.constant 0 : i32
    %c0_i32_0 = arith.constant 0 : i32
    return %arg0, %c0_i32 : i32, i32
  }
}

</mosaic_0001>

<bundles_post_ra>
// kernel: tpu_custom_call.1
= control target key start
LH: loop header
LB: loop body
LE: loop exit
PB: predicated region body
PF: predicated region fallthrough
CT: control target
= control target key end

     0   :  { %9 = vsyncpa [#allocation4], 0  ;;  %s2777_s0 = inlined_call_operand.hbm [shape: s32[1,128], index: 0, kind: input, shape index: {}]   ;;  %s2778_s1 = inlined_call_operand.hbm [shape: f32[128,128], index: 1, kind: input, shape index: {}]   ;;  %s2779_s2 = inlined_call_operand.hbm [shape: f32[256,512], index: 2, kind: input, shape index: {}]   ;;  %s2780_s3 = inlined_call_operand.vmem [shape: f32[1,512], index: 3, kind: input, shape index: {}]   ;;  %s2781_s4 = inlined_call_operand.hbm [shape: f32[8,256], index: 4, kind: output, shape index: {}]  }
   0x1   :  { %10 = vsyncpa [#allocation7], 0 }
   0x2   :  { %11 = vsyncpa [#allocation5], 0  ;;  %s2197_s15 = smov [#allocation6]   ;;  %s2103_s19 = scalar_lea.hbm %s2778_s1, 2048 }
   0x3   :  { %s27_s16 = sshll.u32 %s2197_s15, 4  ;;  %p2104_p0 = scmp.ne.s32.totalorder %s2778_s1, %s2103_s19  ;;  %s28_s16 = int_to_ptr.vmem [resolvable:$true] %s27_s16 }
   0x4   :  { %p2107_p1 = scmp.lt.u32.totalorder %s2103_s19, %s2778_s1 }
   0x6   :  { %p2109_p2 = pnand %p2107_p1, %p2104_p0 }
   0x8   :  { %2112 = shalt.err (!%p2109_p2)
}
   0x9   :  { %s2113_s24 = scalar_lea.vmem %s28_s16, 2048  ;;  %p2118_p4 = scmp.lt.s32.totalorder %s28_s16, %s28_s16 }
   0xa   :  { %p2114_p3 = scmp.ne.s32.totalorder %s28_s16, %s2113_s24  ;;  %p2119_p5 = scmp.lt.s32.totalorder %s2113_s24, %s2113_s24 }
   0xc   :  { %p2120_p6 = por %p2119_p5, %p2118_p4 }
   0xe   :  { %p2121_p7 = pnand %p2120_p6, %p2114_p3 }
  0x10   :  { %2124 = shalt.err (!%p2121_p7)
}
  0x11   :  { %s2198_s25 = smov 128   ;;  %s2199_s26 = smov 8  }
  0x12   :  { %33 = dma.hbm_to_vmem [thread:$0]  %s2778_s1, 2048, %s28_s16, [#allocation7], %s2198_s25, %s2198_s25, %s2199_s26  }
  0x13   :  { %s2200_s29 = smov [#allocation3]   ;;  %s2201_s5 = smov [#allocation8]  }
  0x14   :  { %s18_s30 = sshll.u32 %s2200_s29, 4  ;;  %s39_s6 = sshll.u32 %s2201_s5, 4  ;;  %s19_s30 = int_to_ptr.vmem [resolvable:$true] %s18_s30  ;;  %s40_s6 = int_to_ptr.vmem [resolvable:$true] %s39_s6 }
  0x15   :  { %s2125_s9 = scalar_lea.hbm %s2777_s0, 16 }
  0x16   :  { %p2126_p8 = scmp.ne.s32.totalorder %s2777_s0, %s2125_s9  ;;  %p2129_p9 = scmp.lt.u32.totalorder %s2125_s9, %s2777_s0 }
  0x18   :  { %p2131_p10 = pnand %p2129_p9, %p2126_p8 }
  0x1a   :  { %2134 = shalt.err (!%p2131_p10)
}
  0x1b   :  { %s2135_s1 = scalar_lea.vmem %s19_s30, 16  ;;  %s2139_s14 = scalar_lea.vmem %s19_s30, 32 }
  0x1c   :  { %p2136_p11 = scmp.ne.s32.totalorder %s19_s30, %s2135_s1  ;;  %p2140_p12 = scmp.lt.s32.totalorder %s19_s30, %s19_s30 }
  0x1d   :  { %p2141_p13 = scmp.lt.s32.totalorder %s2139_s14, %s2135_s1 }
  0x1f   :  { %p2142_p0 = por %p2141_p13, %p2140_p12 }
  0x21   :  { %p2143_p1 = pnand %p2142_p0, %p2136_p11 }
  0x23   :  { %2146 = shalt.err (!%p2143_p1)
}
  0x24   :  { %21 = dma.hbm_to_vmem [thread:$0]  %s2777_s0, 16, %s19_s30, [#allocation4]  }
  0x25   :  { %s2147_s19 = scalar_lea.hbm %s2779_s2, 16384 }
  0x26   :  { %p2148_p2 = scmp.ne.s32.totalorder %s2779_s2, %s2147_s19  ;;  %p2151_p3 = scmp.lt.u32.totalorder %s2147_s19, %s2779_s2 }
  0x28   :  { %p2153_p4 = pnand %p2151_p3, %p2148_p2 }
  0x2a   :  { %2156 = shalt.err (!%p2153_p4)
}
  0x2b   :  { %s2157_s24 = scalar_lea.vmem %s40_s6, 16384  ;;  %p2162_p6 = scmp.lt.s32.totalorder %s40_s6, %s40_s6 }
  0x2c   :  { %p2158_p5 = scmp.ne.s32.totalorder %s40_s6, %s2157_s24  ;;  %p2163_p7 = scmp.lt.s32.totalorder %s2157_s24, %s2157_s24 }
  0x2e   :  { %p2164_p8 = por %p2163_p7, %p2162_p6 }
  0x30   :  { %p2165_p9 = pnand %p2164_p8, %p2158_p5 }
  0x32   :  { %2168 = shalt.err (!%p2165_p9)
}
  0x33   :  { %s2202_s0 = smov 512   ;;  %s2203_s25 = smov 32  }
  0x34   :  { %45 = dma.hbm_to_vmem [thread:$0]  %s2779_s2, 16384, %s40_s6, [#allocation7], %s2202_s0, %s2202_s0, %s2203_s25  }
  0x35   :  { %2191 = dma.done.wait [#allocation4], 16  }
  0x36   :  { %2192 = vsyncadd [#allocation4], 4294967280 }
  0x37   :  { %2193 = dma.done.wait [#allocation7], 18432  }
  0x38   :  { %2194 = vsyncadd [#allocation7], 4294948864  ;;  %v2782_v0 = vmov 0.0   ;;  %v74_v1 = vld [vmem:[#allocation8 + $0x8] sm:$0xff]  ;;  %v73_v3 = vld [vmem:[#allocation8] sm:$0xff]  ;;  %vm2206_vm0 = vmmov 0  }
  0x39   :  { %303 = vmatprep.mubr.f32.mxu0 %v2782_v0  ;;  %374 = vmatprep.mubr.f32.mxu1 %v2782_v0  ;;  %v78_v2 = vld [vmem:[#allocation8 + $0x28] sm:$0xff]  ;;  %v77_v5 = vld [vmem:[#allocation8 + $0x20] sm:$0xff]  ;;  %v76_v22 = vld [vmem:[#allocation8 + $0x18] sm:$0xff] }
  0x3a   :  { %v2272_v4 = vpack.c.bf16 %v78_v2, %v74_v1  ;;  %v82_v6 = vld [vmem:[#allocation8 + $0x48] sm:$0xff]  ;;  %v2274_v8 = vpack.c.bf16 %v77_v5, %v73_v3  ;;  %v81_v10 = vld [vmem:[#allocation8 + $0x40] sm:$0xff]  ;;  %v80_v26 = vld [vmem:[#allocation8 + $0x38] sm:$0xff] }
  0x3b   :  { %v86_v7 = vld [vmem:[#allocation8 + $0x68] sm:$0xff]  ;;  %v85_v11 = vld [vmem:[#allocation8 + $0x60] sm:$0xff]  ;;  %v2291_v28 = vpack.c.bf16 %v80_v26, %v76_v22  ;;  %v75_v29 = vld [vmem:[#allocation8 + $0x10] sm:$0xff] }
  0x3c   :  { %2857 = vst [vmem:[#allocation13_spill] sm:$0xff] %v2272_v4  ;;  %v2276_v9 = vpack.c.bf16 %v86_v7, %v82_v6  ;;  %v90_v12 = vld [vmem:[#allocation8 + $0x88] sm:$0xff]  ;;  %1522 = vmatprep.subr.bf16.mxu0 %v2272_v4  ;;  %v2280_v14 = vpack.c.bf16 %v85_v11, %v81_v10  ;;  %v89_v16 = vld [vmem:[#allocation8 + $0x80] sm:$0xff]  ;;  %v79_v30 = vld [vmem:[#allocation8 + $0x30] sm:$0xff] }
  0x3d   :  { %v94_v13 = vld [vmem:[#allocation8 + $0xa8] sm:$0xff]  ;;  %1524 = vmatpush1.bf16.msra.mxu0 %v2274_v8  ;;  %v93_v17 = vld [vmem:[#allocation8 + $0xa0] sm:$0xff]  ;;  %2858 = vst [vmem:[#allocation14_spill] sm:$0xff] %v2291_v28  ;;  %v2293_v31 = vpack.c.bf16 %v79_v30, %v75_v29  ;;  %v84_v32 = vld [vmem:[#allocation8 + $0x58] sm:$0xff]  ;;  %1586 = vmatprep.subr.bf16.mxu1 %v2291_v28 }
  0x3e   :  { %1526 = vmatprep.subr.bf16.mxu0 %v2276_v9  ;;  %v2283_v15 = vpack.c.bf16 %v94_v13, %v90_v12  ;;  %v98_v18 = vld [vmem:[#allocation8 + $0xc8] sm:$0xff]  ;;  %v2286_v20 = vpack.c.bf16 %v93_v17, %v89_v16  ;;  %v97_v21 = vld [vmem:[#allocation8 + $0xc0] sm:$0xff]  ;;  %v88_v33 = vld [vmem:[#allocation8 + $0x78] sm:$0xff] }
  0x3f   :  { %v102_v19 = vld [vmem:[#allocation8 + $0xe8] sm:$0xff]  ;;  %v101_v24 = vld [vmem:[#allocation8 + $0xe0] sm:$0xff]  ;;  %v2299_v36 = vpack.c.bf16 %v88_v33, %v84_v32  ;;  %v83_v37 = vld [vmem:[#allocation8 + $0x50] sm:$0xff]  ;;  %1588 = vmatpush1.bf16.msra.mxu1 %v2293_v31 }
  0x40   :  { %v2289_v23 = vpack.c.bf16 %v102_v19, %v98_v18  ;;  %v106_v25 = vld [vmem:[#allocation8 + $0x108] sm:$0xff]  ;;  %v2296_v34 = vpack.c.bf16 %v101_v24, %v97_v21  ;;  %v105_v35 = vld [vmem:[#allocation8 + $0x100] sm:$0xff]  ;;  %v87_v41 = vld [vmem:[#allocation8 + $0x70] sm:$0xff] }
  0x41   :  { %1528 = vmatpush1.bf16.msra.mxu0 %v2280_v14  ;;  %v110_v27 = vld [vmem:[#allocation8 + $0x128] sm:$0xff]  ;;  %v109_v39 = vld [vmem:[#allocation8 + $0x120] sm:$0xff]  ;;  %1590 = vmatprep.subr.bf16.mxu1 %v2299_v36  ;;  %v2306_v43 = vpack.c.bf16 %v87_v41, %v83_v37  ;;  %v92_v44 = vld [vmem:[#allocation8 + $0x98] sm:$0xff] }
  0x42   :  { %1530 = vmatprep.subr.bf16.mxu0 %v2283_v15  ;;  %v2302_v38 = vpack.c.bf16 %v110_v27, %v106_v25  ;;  %v114_v40 = vld [vmem:[#allocation8 + $0x148] sm:$0xff]  ;;  %v96_v45 = vld [vmem:[#allocation8 + $0xb8] sm:$0xff]  ;;  %v91_v47 = vld [vmem:[#allocation8 + $0x90] sm:$0xff]  ;;  %v2311_v49 = vpack.c.bf16 %v109_v39, %v105_v35 }
  0x43   :  { %v118_v42 = vld [vmem:[#allocation8 + $0x168] sm:$0xff]  ;;  %v2308_v46 = vpack.c.bf16 %v96_v45, %v92_v44  ;;  %v95_v48 = vld [vmem:[#allocation8 + $0xb0] sm:$0xff]  ;;  %v113_v50 = vld [vmem:[#allocation8 + $0x140] sm:$0xff]  ;;  %1592 = vmatpush1.bf16.msra.mxu1 %v2306_v43 }
  0x44   :  { %v100_v51 = vld [vmem:[#allocation8 + $0xd8] sm:$0xff]  ;;  %v2314_v52 = vpack.c.bf16 %v118_v42, %v114_v40  ;;  %v117_v53 = vld [vmem:[#allocation8 + $0x160] sm:$0xff]  ;;  %v122_v54 = vld [vmem:[#allocation8 + $0x188] sm:$0xff]  ;;  %v2317_v55 = vpack.c.bf16 %v95_v48, %v91_v47 }
  0x45   :  { %1532 = vmatpush1.bf16.msra.mxu0 %v2286_v20  ;;  %v104_v56 = vld [vmem:[#allocation8 + $0xf8] sm:$0xff]  ;;  %v126_v57 = vld [vmem:[#allocation8 + $0x1a8] sm:$0xff]  ;;  %1594 = vmatprep.subr.bf16.mxu1 %v2308_v46  ;;  %v99_v59 = vld [vmem:[#allocation8 + $0xd0] sm:$0xff]  ;;  %v2323_v63 = vpack.c.bf16 %v117_v53, %v113_v50 }
  0x46   :  { %1534 = vmatprep.subr.bf16.mxu0 %v2289_v23  ;;  %v2320_v58 = vpack.c.bf16 %v104_v56, %v100_v51  ;;  %v103_v60 = vld [vmem:[#allocation8 + $0xf0] sm:$0xff]  ;;  %v108_v61 = vld [vmem:[#allocation8 + $0x118] sm:$0xff]  ;;  %v2326_v1 = vpack.c.bf16 %v126_v57, %v122_v54  ;;  %v121_v2 = vld [vmem:[#allocation8 + $0x180] sm:$0xff] }
  0x47   :  { %v112_v62 = vld [vmem:[#allocation8 + $0x138] sm:$0xff]  ;;  %2859 = vst [vmem:[#allocation15_spill] sm:$0xff] %v2323_v63  ;;  %v125_v3 = vld [vmem:[#allocation8 + $0x1a0] sm:$0xff]  ;;  %v130_v5 = vld [vmem:[#allocation8 + $0x1c8] sm:$0xff]  ;;  %1596 = vmatpush1.bf16.msra.mxu1 %v2317_v55  ;;  %v2329_v6 = vpack.c.bf16 %v103_v60, %v99_v59 }
  0x48   :  { %2860 = vst [vmem:[#allocation16_spill] sm:$0xff] %v2326_v1  ;;  %v134_v7 = vld [vmem:[#allocation8 + $0x1e8] sm:$0xff]  ;;  %1598 = vmatprep.subr.bf16.mxu1 %v2320_v58  ;;  %v2332_v10 = vpack.c.bf16 %v112_v62, %v108_v61  ;;  %v107_v11 = vld [vmem:[#allocation8 + $0x110] sm:$0xff]  ;;  %v116_v13 = vld [vmem:[#allocation8 + $0x158] sm:$0xff]  ;;  %v2335_v17 = vpack.c.bf16 %v125_v3, %v121_v2 }
  0x49   :  { %1536 = vmatpush1.bf16.msra.mxu0 %v2296_v34  ;;  %v111_v12 = vld [vmem:[#allocation8 + $0x130] sm:$0xff]  ;;  %v120_v16 = vld [vmem:[#allocation8 + $0x178] sm:$0xff]  ;;  %v2338_v18 = vpack.c.bf16 %v134_v7, %v130_v5  ;;  %v129_v19 = vld [vmem:[#allocation8 + $0x1c0] sm:$0xff] }
  0x4a   :  { %1538 = vmatprep.subr.bf16.mxu0 %v2302_v38  ;;  %2861 = vst [vmem:[#allocation17_spill] sm:$0xff] %v2335_v17  ;;  %v133_v21 = vld [vmem:[#allocation8 + $0x1e0] sm:$0xff]  ;;  %v138_v22 = vld [vmem:[#allocation8 + $0x208] sm:$0xff]  ;;  %v2341_v24 = vpack.c.bf16 %v111_v12, %v107_v11  ;;  %v2344_v26 = vpack.c.bf16 %v120_v16, %v116_v13  ;;  %v115_v27 = vld [vmem:[#allocation8 + $0x150] sm:$0xff] }
  0x4b   :  { %2862 = vst [vmem:[#allocation18_spill] sm:$0xff] %v2338_v18  ;;  %1600 = vmatpush1.bf16.msra.mxu1 %v2329_v6  ;;  %v142_v25 = vld [vmem:[#allocation8 + $0x228] sm:$0xff]  ;;  %v119_v29 = vld [vmem:[#allocation8 + $0x170] sm:$0xff]  ;;  %v124_v30 = vld [vmem:[#allocation8 + $0x198] sm:$0xff]  ;;  %v2347_v33 = vpack.c.bf16 %v133_v21, %v129_v19 }
  0x4c   :  { %1602 = vmatprep.subr.bf16.mxu1 %v2332_v10  ;;  %v128_v32 = vld [vmem:[#allocation8 + $0x1b8] sm:$0xff]  ;;  %v2350_v35 = vpack.c.bf16 %v142_v25, %v138_v22  ;;  %v137_v37 = vld [vmem:[#allocation8 + $0x200] sm:$0xff]  ;;  %v146_v40 = vld [vmem:[#allocation8 + $0x248] sm:$0xff]  ;;  %v2353_v41 = vpack.c.bf16 %v119_v29, %v115_v27 }
  0x4d   :  { %1540 = vmatpush1.bf16.msra.mxu0 %v2311_v49  ;;  %2863 = vst [vmem:[#allocation19_spill] sm:$0xff] %v2347_v33  ;;  %v141_v39 = vld [vmem:[#allocation8 + $0x220] sm:$0xff]  ;;  %v150_v42 = vld [vmem:[#allocation8 + $0x268] sm:$0xff]  ;;  %v2356_v44 = vpack.c.bf16 %v128_v32, %v124_v30  ;;  %v123_v45 = vld [vmem:[#allocation8 + $0x190] sm:$0xff] }
  0x4e   :  { %1542 = vmatprep.subr.bf16.mxu0 %v2314_v52  ;;  %2864 = vst [vmem:[#allocation20_spill] sm:$0xff] %v2350_v35  ;;  %v127_v47 = vld [vmem:[#allocation8 + $0x1b0] sm:$0xff]  ;;  %v132_v48 = vld [vmem:[#allocation8 + $0x1d8] sm:$0xff]  ;;  %v2359_v51 = vpack.c.bf16 %v141_v39, %v137_v37  ;;  %v2362_v53 = vpack.c.bf16 %v150_v42, %v146_v40  ;;  %v145_v54 = vld [vmem:[#allocation8 + $0x240] sm:$0xff] }
  0x4f   :  { %1604 = vmatpush1.bf16.msra.mxu1 %v2341_v24  ;;  %v136_v50 = vld [vmem:[#allocation8 + $0x1f8] sm:$0xff]  ;;  %v149_v56 = vld [vmem:[#allocation8 + $0x260] sm:$0xff]  ;;  %v154_v57 = vld [vmem:[#allocation8 + $0x288] sm:$0xff]  ;;  %v2365_v59 = vpack.c.bf16 %v127_v47, %v123_v45 }
  0x50   :  { %1606 = vmatprep.subr.bf16.mxu1 %v2344_v26  ;;  %2865 = vst [vmem:[#allocation21_spill] sm:$0xff] %v2359_v51  ;;  %2866 = vst [vmem:[#allocation22_spill] sm:$0xff] %v2362_v53  ;;  %v158_v60 = vld [vmem:[#allocation8 + $0x2a8] sm:$0xff]  ;;  %v2368_v61 = vpack.c.bf16 %v136_v50, %v132_v48  ;;  %v131_v62 = vld [vmem:[#allocation8 + $0x1d0] sm:$0xff]  ;;  %v2371_v7 = vpack.c.bf16 %v149_v56, %v145_v54 }
  0x51   :  { %1544 = vmatpush1.bf16.msra.mxu0 %v2323_v63  ;;  %v135_v2 = vld [vmem:[#allocation8 + $0x1f0] sm:$0xff]  ;;  %v140_v3 = vld [vmem:[#allocation8 + $0x218] sm:$0xff]  ;;  %v2374_v11 = vpack.c.bf16 %v158_v60, %v154_v57  ;;  %v153_v12 = vld [vmem:[#allocation8 + $0x280] sm:$0xff] }
  0x52   :  { %1546 = vmatprep.subr.bf16.mxu0 %v2326_v1  ;;  %v144_v5 = vld [vmem:[#allocation8 + $0x238] sm:$0xff]  ;;  %2867 = vst [vmem:[#allocation23_spill] sm:$0xff] %v2371_v7  ;;  %v157_v13 = vld [vmem:[#allocation8 + $0x2a0] sm:$0xff]  ;;  %v162_v16 = vld [vmem:[#allocation8 + $0x2c8] sm:$0xff]  ;;  %v2377_v19 = vpack.c.bf16 %v135_v2, %v131_v62 }
  0x53   :  { %1608 = vmatpush1.bf16.msra.mxu1 %v2353_v41  ;;  %2868 = vst [vmem:[#allocation24_spill] sm:$0xff] %v2374_v11  ;;  %v166_v21 = vld [vmem:[#allocation8 + $0x2e8] sm:$0xff]  ;;  %v2380_v22 = vpack.c.bf16 %v144_v5, %v140_v3  ;;  %v139_v25 = vld [vmem:[#allocation8 + $0x210] sm:$0xff]  ;;  %v148_v29 = vld [vmem:[#allocation8 + $0x258] sm:$0xff]  ;;  %v2383_v32 = vpack.c.bf16 %v157_v13, %v153_v12 }
  0x54   :  { %1610 = vmatprep.subr.bf16.mxu1 %v2356_v44  ;;  %v143_v27 = vld [vmem:[#allocation8 + $0x230] sm:$0xff]  ;;  %v152_v30 = vld [vmem:[#allocation8 + $0x278] sm:$0xff]  ;;  %v2386_v37 = vpack.c.bf16 %v166_v21, %v162_v16  ;;  %v161_v39 = vld [vmem:[#allocation8 + $0x2c0] sm:$0xff] }
  0x55   :  { %1548 = vmatpush1.bf16.msra.mxu0 %v2335_v17  ;;  %2869 = vst [vmem:[#allocation25_spill] sm:$0xff] %v2383_v32  ;;  %v165_v40 = vld [vmem:[#allocation8 + $0x2e0] sm:$0xff]  ;;  %v170_v42 = vld [vmem:[#allocation8 + $0x308] sm:$0xff]  ;;  %v2389_v45 = vpack.c.bf16 %v143_v27, %v139_v25  ;;  %v2392_v48 = vpack.c.bf16 %v152_v30, %v148_v29  ;;  %v147_v50 = vld [vmem:[#allocation8 + $0x250] sm:$0xff] }
  0x56   :  { %1550 = vmatprep.subr.bf16.mxu0 %v2338_v18  ;;  %2870 = vst [vmem:[#allocation26_spill] sm:$0xff] %v2386_v37  ;;  %v174_v47 = vld [vmem:[#allocation8 + $0x328] sm:$0xff]  ;;  %v151_v54 = vld [vmem:[#allocation8 + $0x270] sm:$0xff]  ;;  %v156_v56 = vld [vmem:[#allocation8 + $0x298] sm:$0xff]  ;;  %v2395_v60 = vpack.c.bf16 %v165_v40, %v161_v39 }
  0x57   :  { %1612 = vmatpush1.bf16.msra.mxu1 %v2365_v59  ;;  %v160_v57 = vld [vmem:[#allocation8 + $0x2b8] sm:$0xff]  ;;  %v2398_v62 = vpack.c.bf16 %v174_v47, %v170_v42  ;;  %v169_v2 = vld [vmem:[#allocation8 + $0x300] sm:$0xff]  ;;  %v178_v5 = vld [vmem:[#allocation8 + $0x348] sm:$0xff]  ;;  %v2401_v12 = vpack.c.bf16 %v151_v54, %v147_v50 }
  0x58   :  { %1614 = vmatprep.subr.bf16.mxu1 %v2368_v61  ;;  %2871 = vst [vmem:[#allocation27_spill] sm:$0xff] %v2395_v60  ;;  %v173_v3 = vld [vmem:[#allocation8 + $0x320] sm:$0xff]  ;;  %v182_v13 = vld [vmem:[#allocation8 + $0x368] sm:$0xff]  ;;  %v2404_v16 = vpack.c.bf16 %v160_v57, %v156_v56  ;;  %v155_v21 = vld [vmem:[#allocation8 + $0x290] sm:$0xff] }
  0x59   :  { %1552 = vmatpush1.bf16.msra.mxu0 %v2347_v33  ;;  %2872 = vst [vmem:[#allocation28_spill] sm:$0xff] %v2398_v62  ;;  %v159_v25 = vld [vmem:[#allocation8 + $0x2b0] sm:$0xff]  ;;  %v164_v27 = vld [vmem:[#allocation8 + $0x2d8] sm:$0xff]  ;;  %v2407_v30 = vpack.c.bf16 %v173_v3, %v169_v2  ;;  %v2410_v39 = vpack.c.bf16 %v182_v13, %v178_v5  ;;  %v177_v40 = vld [vmem:[#allocation8 + $0x340] sm:$0xff] }
  0x5a   :  { %1554 = vmatprep.subr.bf16.mxu0 %v2350_v35  ;;  %v168_v29 = vld [vmem:[#allocation8 + $0x2f8] sm:$0xff]  ;;  %v181_v42 = vld [vmem:[#allocation8 + $0x360] sm:$0xff]  ;;  %v186_v47 = vld [vmem:[#allocation8 + $0x388] sm:$0xff]  ;;  %v2413_v50 = vpack.c.bf16 %v159_v25, %v155_v21 }
  0x5b   :  { %1616 = vmatpush1.bf16.msra.mxu1 %v2377_v19  ;;  %2873 = vst [vmem:[#allocation29_spill] sm:$0xff] %v2407_v30  ;;  %2874 = vst [vmem:[#allocation30_spill] sm:$0xff] %v2410_v39  ;;  %v190_v54 = vld [vmem:[#allocation8 + $0x3a8] sm:$0xff]  ;;  %v2416_v56 = vpack.c.bf16 %v168_v29, %v164_v27  ;;  %v163_v57 = vld [vmem:[#allocation8 + $0x2d0] sm:$0xff]  ;;  %v2419_v5 = vpack.c.bf16 %v181_v42, %v177_v40 }
  0x5c   :  { %1618 = vmatprep.subr.bf16.mxu1 %v2380_v22  ;;  %v167_v0 = vld [vmem:[#allocation8 + $0x2f0] sm:$0xff]  ;;  %v172_v2 = vld [vmem:[#allocation8 + $0x318] sm:$0xff]  ;;  %v2422_v13 = vpack.c.bf16 %v190_v54, %v186_v47  ;;  %v189_v21 = vld [vmem:[#allocation8 + $0x3a0] sm:$0xff] }
  0x5d   :  { %1556 = vmatpush1.bf16.msra.mxu0 %v2359_v51  ;;  %v176_v3 = vld [vmem:[#allocation8 + $0x338] sm:$0xff]  ;;  %2875 = vst [vmem:[#allocation31_spill] sm:$0xff] %v2419_v5  ;;  %v194_v25 = vld [vmem:[#allocation8 + $0x3c8] sm:$0xff] }
  0x5e   :  { %1558 = vmatprep.subr.bf16.mxu0 %v2362_v53  ;;  %2876 = vst [vmem:[#allocation32_spill] sm:$0xff] %v2422_v13  ;;  %v198_v27 = vld [vmem:[#allocation8 + $0x3e8] sm:$0xff]  ;;  %v2428_v29 = vpack.c.bf16 %v176_v3, %v172_v2  ;;  %v180_v40 = vld [vmem:[#allocation8 + $0x358] sm:$0xff]  ;;  %v179_v3 = vld [vmem:[#allocation8 + $0x350] sm:$0xff] }
  0x5f   :  { %1620 = vmatpush1.bf16.msra.mxu1 %v2389_v45  ;;  %v184_v42 = vld [vmem:[#allocation8 + $0x378] sm:$0xff]  ;;  %v2434_v54 = vpack.c.bf16 %v198_v27, %v194_v25  ;;  %v191_v25 = vld [vmem:[#allocation8 + $0x3b0] sm:$0xff] }
  0x60   :  { %1622 = vmatprep.subr.bf16.mxu1 %v2392_v48  ;;  %v2440_v2 = vpack.c.bf16 %v184_v42, %v180_v40  ;;  %v196_v27 = vld [vmem:[#allocation8 + $0x3d8] sm:$0xff]  ;;  %v195_v42 = vld [vmem:[#allocation8 + $0x3d0] sm:$0xff] }
  0x61   :  { %1560 = vmatpush1.bf16.msra.mxu0 %v2371_v7  ;;  %2878 = vst [vmem:[#allocation34_spill] sm:$0xff] %v2434_v54  ;;  %v200_v40 = vld [vmem:[#allocation8 + $0x3f8] sm:$0xff] }
  0x62   :  { %1562 = vmatprep.subr.bf16.mxu0 %v2374_v11  ;;  %v188_v11 = vld [vmem:[#allocation8 + $0x398] sm:$0xff] }
  0x63   :  { %1624 = vmatpush1.bf16.msra.mxu1 %v2401_v12 }
  0x64   :  { %1626 = vmatprep.subr.bf16.mxu1 %v2404_v16 }
  0x65   :  { %1564 = vmatpush1.bf16.msra.mxu0 %v2383_v32  ;;  %v183_v32 = vld [vmem:[#allocation8 + $0x370] sm:$0xff] }
  0x66   :  { %1566 = vmatprep.subr.bf16.mxu0 %v2386_v37  ;;  %v171_v37 = vld [vmem:[#allocation8 + $0x310] sm:$0xff] }
  0x67   :  { %1628 = vmatpush1.bf16.msra.mxu1 %v2413_v50 }
  0x68   :  { %1630 = vmatprep.subr.bf16.mxu1 %v2416_v56 }
  0x69   :  { %1568 = vmatpush1.bf16.msra.mxu0 %v2395_v60  ;;  %v2425_v60 = vpack.c.bf16 %v167_v0, %v163_v57  ;;  %v197_v0 = vld [vmem:[#allocation8 + $0x3e0] sm:$0xff] }
  0x6a   :  { %1570 = vmatprep.subr.bf16.mxu0 %v2398_v62  ;;  %v185_v62 = vld [vmem:[#allocation8 + $0x380] sm:$0xff] }
  0x6b   :  { %v2431_v47 = vpack.c.bf16 %v189_v21, %v185_v62  ;;  %1632 = vmatpush1.bf16.msra.mxu1 %v2425_v60  ;;  %v2447_v21 = vpack.c.bf16 %v183_v32, %v179_v3  ;;  %v2458_v32 = vpack.c.bf16 %v200_v40, %v196_v27  ;;  %v58_v3 = vld [vmem:[#allocation6 + $0x8] sm:$0xff]  ;;  %v61_v40 = vld [vmem:[#allocation6 + $0x20] sm:$0xff] }
  0x6c   :  { %1634 = vmatprep.subr.bf16.mxu1 %v2428_v29 }
  0x6d   :  { %1572 = vmatpush1.bf16.msra.mxu0 %v2407_v30  ;;  %v175_v30 = vld [vmem:[#allocation8 + $0x330] sm:$0xff]  ;;  %2877 = vst [vmem:[#allocation33_spill] sm:$0xff] %v2431_v47 }
  0x6e   :  { %1574 = vmatprep.subr.bf16.mxu0 %v2410_v39  ;;  %v193_v39 = vld [vmem:[#allocation8 + $0x3c0] sm:$0xff]  ;;  %v2437_v57 = vpack.c.bf16 %v175_v30, %v171_v37  ;;  %v187_v30 = vld [vmem:[#allocation8 + $0x390] sm:$0xff] }
  0x6f   :  { %v2443_v62 = vpack.c.bf16 %v197_v0, %v193_v39  ;;  %v2454_v39 = vpack.c.bf16 %v191_v25, %v187_v30  ;;  %v2814_v0 = vmov 0.0|0.0   ;;  %v59_v30 = vld [vmem:[#allocation6 + $0x10] sm:$0xff]  ;;  %v60_v25 = vld [vmem:[#allocation6 + $0x18] sm:$0xff] }
  0x70   :  { %1636 = vmatpush1.bf16.msra.mxu1 %v2437_v57  ;;  %v2472_v27 = vpack.c.bf16 %v60_v25, %v59_v30  ;;  %v65_v25 = vld [vmem:[#allocation6 + $0x40] sm:$0xff] }
  0x71   :  { %1576 = vmatpush1.bf16.msra.mxu0 %v2419_v5  ;;  %v192_v5 = vld [vmem:[#allocation8 + $0x3b8] sm:$0xff]  ;;  %2879 = vst [vmem:[#allocation35_spill] sm:$0xff] %v2443_v62  ;;  %1638 = vmatprep.subr.bf16.mxu1 %v2440_v2 }
  0x72   :  { %1578 = vmatprep.subr.bf16.mxu0 %v2422_v13  ;;  %v2450_v37 = vpack.c.bf16 %v192_v5, %v188_v11  ;;  %v199_v11 = vld [vmem:[#allocation8 + $0x3f0] sm:$0xff]  ;;  %v57_v5 = vld [vmem:[#allocation6] sm:$0xff]  ;;  %2882 = vst [vmem:[#allocation37_spill] sm:$0xff] %v2472_v27 }
  0x74   :  { %1640 = vmatpush1.bf16.msra.mxu1 %v2447_v21 }
  0x75   :  { %1580 = vmatpush1.bf16.msra.mxu0 %v2431_v47  ;;  %1642 = vmatprep.subr.bf16.mxu1 %v2450_v37  ;;  %v2464_v47 = vpack.c.bf16 %v58_v3, %v57_v5  ;;  %v63_v5 = vld [vmem:[#allocation6 + $0x30] sm:$0xff]  ;;  %v64_v3 = vld [vmem:[#allocation6 + $0x38] sm:$0xff] }
  0x76   :  { %1582 = vmatprep.subr.bf16.mxu0 %v2434_v54  ;;  %v2880_v54 = vmov 0.0   ;;  %v2486_v30 = vpack.c.bf16 %v64_v3, %v63_v5  ;;  %v67_v5 = vld [vmem:[#allocation6 + $0x50] sm:$0xff]  ;;  %v68_v3 = vld [vmem:[#allocation6 + $0x58] sm:$0xff] }
  0x77   :  { %2881 = vst [vmem:[#allocation36_spill] sm:$0xff] %v2464_v47 }
  0x78   :  { %1644 = vmatpush1.bf16.msra.mxu1 %v2454_v39  ;;  %2884 = vst [vmem:[#allocation39_spill] sm:$0xff] %v2486_v30 }
  0x79   :  { %1584 = vmatpush1.bf16.msra.mxu0 %v2443_v62  ;;  %v2462_v62 = vpack.c.bf16 %v199_v11, %v195_v42  ;;  %1646 = vmatprep.subr.bf16.mxu1 %v2458_v32  ;;  %v62_v42 = vld [vmem:[#allocation6 + $0x28] sm:$0xff] }
  0x7a   :  { %1649 = vmatprep.subr.bf16.mxu0 %v2814_v0  ;;  %v2480_v11 = vpack.c.bf16 %v62_v42, %v61_v40  ;;  %v66_v40 = vld [vmem:[#allocation6 + $0x48] sm:$0xff] }
  0x7b   :  { %v2492_v42 = vpack.c.bf16 %v66_v40, %v65_v25  ;;  %v69_v25 = vld [vmem:[#allocation6 + $0x60] sm:$0xff]  ;;  %v70_v40 = vld [vmem:[#allocation6 + $0x68] sm:$0xff] }
  0x7c   :  { %304 = vmatmul.mubr.f32.vlgmr.msra.gmra.mrb[0].mxu0 %v2880_v54  ;;  %1648 = vmatpush1.bf16.msra.mxu1 %v2462_v62  ;;  %2883 = vst [vmem:[#allocation38_spill] sm:$0xff] %v2480_v11 }
  0x7d   :  { %1673 = vmatprep.subr.bf16.mxu1 %v2814_v0  ;;  %2885 = vst [vmem:[#allocation40_spill] sm:$0xff] %v2492_v42  ;;  %1343 = vmatprep.mubr.msk.f32.mxu0 %vm2206_vm0, %v2880_v54 }
  0x7f   :  { %375 = vmatmul.mubr.f32.vlgmr.msra.gmra.mrb[0].mxu1 %v2880_v54 }
  0x80   :  { %1675 = vmatpush3.bf16.msra.mxu1 %v2464_v47  ;;  %1378 = vmatprep.mubr.msk.f32.mxu1 %vm2206_vm0, %v2880_v54 }
  0x81   :  { %1676 = vmatprep.subr.bf16.mxu1 %v2814_v0 }
  0x82   :  { %1651 = vmatpush3.bf16.xpose.msra.mxu0 %v2464_v47 }
  0x83   :  { %1652 = vmatprep.subr.bf16.mxu0 %v2814_v0 }
  0x84   :  { %1678 = vmatpush3.bf16.msra.mxu1 %v2472_v27 }
  0x85   :  { %1679 = vmatprep.subr.bf16.mxu1 %v2814_v0 }
  0x88   :  { %1681 = vmatpush3.bf16.msra.mxu1 %v2480_v11 }
  0x89   :  { %1682 = vmatprep.subr.bf16.mxu1 %v2814_v0 }
  0x8a   :  { %1654 = vmatpush3.bf16.xpose.msra.mxu0 %v2472_v27  ;;  %v72_v27 = vld [vmem:[#allocation6 + $0x78] sm:$0xff] }
  0x8b   :  { %1655 = vmatprep.subr.bf16.mxu0 %v2814_v0 }
  0x8c   :  { %1684 = vmatpush3.bf16.msra.mxu1 %v2486_v30 }
  0x8d   :  { %1685 = vmatprep.subr.bf16.mxu1 %v2814_v0 }
  0x90   :  { %1687 = vmatpush3.bf16.msra.mxu1 %v2492_v42 }
  0x91   :  { %1688 = vmatprep.subr.bf16.mxu1 %v2814_v0 }
  0x92   :  { %1657 = vmatpush3.bf16.xpose.msra.mxu0 %v2480_v11  ;;  %v2498_v11 = vpack.c.bf16 %v68_v3, %v67_v5  ;;  %v203_v3 = vlaneseq }
  0x93   :  { %1658 = vmatprep.subr.bf16.mxu0 %v2814_v0 }
  0x94   :  { %2886 = vst [vmem:[#allocation41_spill] sm:$0xff] %v2498_v11  ;;  %1690 = vmatpush3.bf16.msra.mxu1 %v2498_v11 }
  0x95   :  { %1691 = vmatprep.subr.bf16.mxu1 %v2814_v0 }
  0x9a   :  { %1660 = vmatpush3.bf16.xpose.msra.mxu0 %v2486_v30  ;;  %v2504_v30 = vpack.c.bf16 %v70_v40, %v69_v25  ;;  %v2520_v25 = vshrl.u32 %v203_v3, 7 }
  0x9b   :  { %1661 = vmatprep.subr.bf16.mxu0 %v2814_v0 }
  0x9c   :  { %2887 = vst [vmem:[#allocation42_spill] sm:$0xff] %v2504_v30  ;;  %1693 = vmatpush3.bf16.msra.mxu1 %v2504_v30  ;;  %v205_v40 = vsub.s32 0, %v2520_v25  ;;  %v217_v51 = vsub.s32 3, %v2520_v25 }
  0x9d   :  { %1694 = vmatprep.subr.bf16.mxu1 %v2814_v0 }
  0xa2   :  { %1663 = vmatpush3.bf16.xpose.msra.mxu0 %v2492_v42  ;;  %v71_v42 = vld [vmem:[#allocation6 + $0x70] sm:$0xff] }
  0xa3   :  { %1664 = vmatprep.subr.bf16.mxu0 %v2814_v0  ;;  %v2511_v5 = vpack.c.bf16 %v72_v27, %v71_v42  ;;  %v201_v27 = vld [vmem:[%s2780_s3] sm:$0xf]  ;;  %v209_v42 = vsub.s32 1, %v2520_v25  ;;  %s2208_s3 = smov [#allocation9]  }
  0xa4   :  { %s1192_s29 = sshll.u32 %s2208_s3, 4  ;;  %s1193_s29 = int_to_ptr.vmem [resolvable:$true] %s1192_s29 }
  0xa5   :  { %2888 = vst [vmem:[#allocation43_spill] sm:$0xff] %v2511_v5  ;;  %1696 = vmatpush3.bf16.msra.mxu1 %v2511_v5  ;;  %s2169_s30 = scalar_lea.vmem %s1193_s29, 256  ;;  %p2174_p11 = scmp.lt.s32.totalorder %s1193_s29, %s1193_s29 }
  0xa6   :  { %1698 = vmatprep.subr.bf16.mxu1 %v2272_v4  ;;  %p2170_p10 = scmp.ne.s32.totalorder %s1193_s29, %s2169_s30  ;;  %p2175_p12 = scmp.lt.s32.totalorder %s2169_s30, %s2169_s30 }
  0xa8   :  { %p2176_p13 = por %p2175_p12, %p2174_p11 }
  0xaa   :  { %1666 = vmatpush3.bf16.xpose.msra.mxu0 %v2498_v11  ;;  %v2529_v11 = vrot.slane %v201_v27, %v209_v42  ;;  %v2535_v42 = vrot.slane %v201_v27, %v217_v51  ;;  %p2177_p0 = pnand %p2176_p13, %p2170_p10 }
  0xab   :  { %1667 = vmatprep.subr.bf16.mxu0 %v2814_v0 }
  0xac   :  { %2890 = vst [vmem:[#allocation45_spill] sm:$0xff] %v2529_v11 }
  0xb2   :  { %1669 = vmatpush3.bf16.xpose.msra.mxu0 %v2504_v30 }
  0xb3   :  { %1670 = vmatprep.subr.bf16.mxu0 %v2814_v0  ;;  %v2527_v0 = vrot.slane %v201_v27, %v205_v40  ;;  %v213_v40 = vsub.s32 2, %v2520_v25 }
  0xb5   :  { %2889 = vst [vmem:[#allocation44_spill] sm:$0xff] %v2527_v0 }
  0xba   :  { %1672 = vmatpush3.bf16.xpose.msra.mxu0 %v2511_v5 }
  0xbb   :  { %1762 = vmatprep.subr.bf16.mxu0 %v2291_v28 }
 0x14f   :  { %v305_v30 = vpop.f32.mrb[0].mxu0 }
 0x150   :  { %v306_v4 = vadd.f32 %v305_v30, %v2527_v0  ;;  %v307_v5 = vpop.f32.mrb[1].mxu0  ;;  %v2537_v0 = vrot.slane %v201_v27, %v213_v40 }
 0x151   :  { %v308_v3 = vadd.f32 %v307_v5, %v2529_v11 }
 0x152   :  { %v1203_v28 = vmul.f32 -1.442695, %v306_v4  ;;  %v376_v47 = vpop.f32.mrb[0].mxu1 }
 0x153   :  { %v1204_v54 = vmul.f32 -1.442695, %v308_v3  ;;  %v378_v13 = vpop.f32.mrb[1].mxu1  ;;  %v377_v5 = vadd.f32 %v376_v47, %v2537_v0 }
 0x154   :  { %2061 = vpow2.f32 %v1203_v28  ;;  %v379_v4 = vadd.f32 %v378_v13, %v2535_v42 }
 0x155   :  { %2063 = vpow2.f32 %v1204_v54 }
 0x15e   :  { %v2062_v7 = vpop.eup %2061 }
 0x15f   :  { %v384_v53 = vadd.f32 1.0, %v2062_v7  ;;  %v2064_v35 = vpop.eup %2063 }
 0x160   :  { %v390_v30 = vadd.f32 1.0, %v2064_v35  ;;  %v2207_v35 = vmov -1e+30  }
 0x161   :  { %2065 = vrcp.f32 %v384_v53 }
 0x162   :  { %2067 = vrcp.f32 %v390_v30 }
 0x16b   :  { %v2066_v28 = vpop.eup %2065 }
 0x16c   :  { %v393_v54 = vmul.f32 %v2066_v28, %v379_v4  ;;  %v2068_v7 = vpop.eup %2067 }
 0x16d   :  { %v396_v11 = vsub.f32 1.0, %v2068_v7  ;;  %v398_v18 = vmul.f32 0.0, %v2068_v7 }
 0x16e   :  { %v394_v3 = vadd.f32 %v393_v54, %v377_v5 }
 0x170   :  { %2069 = vtanh.f32 %v394_v3 }
 0x17a   :  { %v2070_v53 = vpop.eup %2069 }
 0x17b   :  { %v397_v33 = vmul.f32 %v2070_v53, %v396_v11  ;;  %v2893_v53 = vld [vmem:[#allocation19_spill] sm:$0xff] }
 0x17d   :  { %v2541_v51 = vadd.f32 %v398_v18, %v397_v33  ;;  %v2891_v18 = vmov 0.0|0.0   ;;  %v1202_v33 = vld [vmem:[#allocation3] ss:$0 sm:$0xff] }
 0x17e   :  { %vm233_vm1 = vcmp.eq.s32.totalorder %v2520_v25, %v1202_v33  ;;  %v2892_v25 = vld [vmem:[#allocation18_spill] sm:$0xff]  ;;  %v2894_v33 = vld [vmem:[#allocation20_spill] sm:$0xff] }
 0x17f   :  { %1344 = vmatmul.mubr.f32.vlgmr.msra.gmra.mrb[2].mxu0 %v2541_v51  ;;  %v2577_v13 = vsel %vm233_vm1, 0.0, %v2207_v35  ;;  %v2895_v35 = vld [vmem:[#allocation21_spill] sm:$0xff] }
 0x180   :  { %1764 = vmatpush1.bf16.msra.mxu0 %v2293_v31 }
 0x181   :  { %1766 = vmatprep.subr.bf16.mxu0 %v2299_v36 }
 0x184   :  { %1768 = vmatpush1.bf16.msra.mxu0 %v2306_v43 }
 0x185   :  { %1770 = vmatprep.subr.bf16.mxu0 %v2308_v46 }
 0x188   :  { %1772 = vmatpush1.bf16.msra.mxu0 %v2317_v55 }
 0x189   :  { %1774 = vmatprep.subr.bf16.mxu0 %v2320_v58 }
 0x18c   :  { %1776 = vmatpush1.bf16.msra.mxu0 %v2329_v6 }
 0x18d   :  { %1778 = vmatprep.subr.bf16.mxu0 %v2332_v10 }
 0x190   :  { %1780 = vmatpush1.bf16.msra.mxu0 %v2341_v24 }
 0x191   :  { %1782 = vmatprep.subr.bf16.mxu0 %v2344_v26 }
 0x194   :  { %1784 = vmatpush1.bf16.msra.mxu0 %v2353_v41 }
 0x195   :  { %1786 = vmatprep.subr.bf16.mxu0 %v2356_v44 }
 0x198   :  { %1788 = vmatpush1.bf16.msra.mxu0 %v2365_v59 }
 0x199   :  { %1790 = vmatprep.subr.bf16.mxu0 %v2368_v61 }
 0x19c   :  { %1792 = vmatpush1.bf16.msra.mxu0 %v2377_v19 }
 0x19d   :  { %1794 = vmatprep.subr.bf16.mxu0 %v2380_v22 }
 0x1a0   :  { %1796 = vmatpush1.bf16.msra.mxu0 %v2389_v45 }
 0x1a1   :  { %1798 = vmatprep.subr.bf16.mxu0 %v2392_v48 }
 0x1a4   :  { %1800 = vmatpush1.bf16.msra.mxu0 %v2401_v12 }
 0x1a5   :  { %1802 = vmatprep.subr.bf16.mxu0 %v2404_v16 }
 0x1a8   :  { %1804 = vmatpush1.bf16.msra.mxu0 %v2413_v50 }
 0x1a9   :  { %1806 = vmatprep.subr.bf16.mxu0 %v2416_v56 }
 0x1ac   :  { %1808 = vmatpush1.bf16.msra.mxu0 %v2425_v60 }
 0x1ad   :  { %1810 = vmatprep.subr.bf16.mxu0 %v2428_v29 }
 0x1b0   :  { %1812 = vmatpush1.bf16.msra.mxu0 %v2437_v57 }
 0x1b1   :  { %1814 = vmatprep.subr.bf16.mxu0 %v2440_v2 }
 0x1b4   :  { %1816 = vmatpush1.bf16.msra.mxu0 %v2447_v21 }
 0x1b5   :  { %1818 = vmatprep.subr.bf16.mxu0 %v2450_v37 }
 0x1b8   :  { %1820 = vmatpush1.bf16.msra.mxu0 %v2454_v39 }
 0x1b9   :  { %1822 = vmatprep.subr.bf16.mxu0 %v2458_v32 }
 0x1bc   :  { %1824 = vmatpush1.bf16.msra.mxu0 %v2462_v62 }
 0x1bd   :  { %1849 = vmatprep.subr.bf16.mxu0 %v2891_v18 }
 0x252   :  { %v466_v47 = vpop.f32.mrb[2].mxu0 }
 0x253   :  { %v467_v11 = vadd.f32 %v466_v47, %v2577_v13  ;;  %v1345_v27 = vpop.f32.mrb[3].mxu0  ;;  %v2896_v47 = vld [vmem:[#allocation22_spill] sm:$0xff] }
 0x254   :  { %v2898_v27 = vld [vmem:[#allocation24_spill] sm:$0xff] }
 0x255   :  { %470 = vmax.xlane.f32.xlu0 %v467_v11 }
 0x2e2   :  { %v471_v40 = vpop.xlane.xlu0 %470 }
 0x2e3   :  { %v472_v30 = vsub.f32 %v467_v11, %v471_v40  ;;  %v2897_v11 = vld [vmem:[#allocation23_spill] sm:$0xff]  ;;  %v2899_v40 = vld [vmem:[#allocation25_spill] sm:$0xff] }
 0x2e5   :  { %v473_v4 = vmul.f32 1.442695, %v472_v30  ;;  %v2900_v30 = vld [vmem:[#allocation26_spill] sm:$0xff] }
 0x2e7   :  { %2071 = vpow2.f32 %v473_v4  ;;  %v2901_v4 = vld [vmem:[#allocation27_spill] sm:$0xff] }
 0x2f1   :  { %v2072_v28 = vpop.eup %2071 }
 0x2f2   :  { %475 = vadd.xlane.f32.xlu0 %v2072_v28 }
 0x37f   :  { %v476_v5 = vpop.xlane.xlu0 %475 }
 0x380   :  { %v477_v54 = vadd.f32 1e-16, %v476_v5  ;;  %v2903_v5 = vld [vmem:[#allocation29_spill] sm:$0xff] }
 0x382   :  { %2073 = vrcp.f32 %v477_v54  ;;  %v2904_v54 = vld [vmem:[#allocation30_spill] sm:$0xff] }
 0x38c   :  { %v2074_v3 = vpop.eup %2073 }
 0x38d   :  { %v479_v7 = vmul.f32 %v2074_v3, %v2072_v28  ;;  %v2902_v28 = vld [vmem:[#allocation28_spill] sm:$0xff]  ;;  %v2905_v3 = vld [vmem:[#allocation31_spill] sm:$0xff] }
 0x38f   :  { %1379 = vmatmul.mubr.f32.vlgmr.msra.gmra.mrb[2].mxu1 %v479_v7  ;;  %v2906_v7 = vld [vmem:[#allocation32_spill] sm:$0xff] }
 0x390   :  { %1700 = vmatpush1.bf16.msra.mxu1 %v2274_v8 }
 0x391   :  { %1702 = vmatprep.subr.bf16.mxu1 %v2276_v9 }
 0x394   :  { %1704 = vmatpush1.bf16.msra.mxu1 %v2280_v14 }
 0x395   :  { %1706 = vmatprep.subr.bf16.mxu1 %v2283_v15 }
 0x398   :  { %1708 = vmatpush1.bf16.msra.mxu1 %v2286_v20 }
 0x399   :  { %1710 = vmatprep.subr.bf16.mxu1 %v2289_v23 }
 0x39c   :  { %1712 = vmatpush1.bf16.msra.mxu1 %v2296_v34 }
 0x39d   :  { %1714 = vmatprep.subr.bf16.mxu1 %v2302_v38 }
 0x3a0   :  { %1716 = vmatpush1.bf16.msra.mxu1 %v2311_v49 }
 0x3a1   :  { %1718 = vmatprep.subr.bf16.mxu1 %v2314_v52 }
 0x3a4   :  { %1720 = vmatpush1.bf16.msra.mxu1 %v2323_v63 }
 0x3a5   :  { %1722 = vmatprep.subr.bf16.mxu1 %v2326_v1 }
 0x3a8   :  { %1724 = vmatpush1.bf16.msra.mxu1 %v2335_v17 }
 0x3a9   :  { %1726 = vmatprep.subr.bf16.mxu1 %v2892_v25 }
 0x3ac   :  { %1728 = vmatpush1.bf16.msra.mxu1 %v2893_v53 }
 0x3ad   :  { %1730 = vmatprep.subr.bf16.mxu1 %v2894_v33 }
 0x3b0   :  { %1732 = vmatpush1.bf16.msra.mxu1 %v2895_v35  ;;  %v2922_v35 = vld [vmem:[#allocation45_spill] sm:$0xff] }
 0x3b1   :  { %1734 = vmatprep.subr.bf16.mxu1 %v2896_v47  ;;  %v2907_v47 = vld [vmem:[#allocation33_spill] sm:$0xff] }
 0x3b4   :  { %1736 = vmatpush1.bf16.msra.mxu1 %v2897_v11  ;;  %v2908_v11 = vld [vmem:[#allocation34_spill] sm:$0xff] }
 0x3b5   :  { %1738 = vmatprep.subr.bf16.mxu1 %v2898_v27  ;;  %v2909_v27 = vld [vmem:[#allocation35_spill] sm:$0xff] }
 0x3b8   :  { %1740 = vmatpush1.bf16.msra.mxu1 %v2899_v40 }
 0x3b9   :  { %1742 = vmatprep.subr.bf16.mxu1 %v2900_v30 }
 0x3bc   :  { %1744 = vmatpush1.bf16.msra.mxu1 %v2901_v4 }
 0x3bd   :  { %1746 = vmatprep.subr.bf16.mxu1 %v2902_v28 }
 0x3c0   :  { %1748 = vmatpush1.bf16.msra.mxu1 %v2903_v5  ;;  %v2921_v5 = vld [vmem:[#allocation44_spill] sm:$0xff] }
 0x3c1   :  { %1750 = vmatprep.subr.bf16.mxu1 %v2904_v54  ;;  %v2910_v54 = vld [vmem:[#allocation36_spill] sm:$0xff] }
 0x3c4   :  { %1752 = vmatpush1.bf16.msra.mxu1 %v2905_v3  ;;  %v2911_v3 = vmov 0.0  }
 0x3c5   :  { %1754 = vmatprep.subr.bf16.mxu1 %v2906_v7 }
 0x3c8   :  { %1756 = vmatpush1.bf16.msra.mxu1 %v2907_v47 }
 0x3c9   :  { %1758 = vmatprep.subr.bf16.mxu1 %v2908_v11  ;;  %v2918_v11 = vld [vmem:[#allocation43_spill] sm:$0xff] }
 0x3cc   :  { %1760 = vmatpush1.bf16.msra.mxu1 %v2909_v27  ;;  %v2914_v27 = vld [vmem:[#allocation39_spill] sm:$0xff] }
 0x3cd   :  { %1825 = vmatprep.subr.bf16.mxu1 %v2891_v18 }
 0x462   :  { %v546_v30 = vpop.f32.mrb[2].mxu1 }
 0x463   :  { %v1380_v4 = vpop.f32.mrb[3].mxu1  ;;  %618 = vmatprep.mubr.f32.mxu1 %v546_v30  ;;  %689 = vmatprep.mubr.f32.mxu0 %v546_v30  ;;  %v2913_v30 = vld [vmem:[#allocation38_spill] sm:$0xff] }
 0x464   :  { %619 = vmatmul.mubr.f32.vlgmr.msra.gmra.mrb[4].mxu1 %v2541_v51  ;;  %690 = vmatmul.mubr.f32.vlgmr.msra.gmra.mrb[4].mxu0 %v2541_v51  ;;  %v2912_v4 = vld [vmem:[#allocation37_spill] sm:$0xff] }
 0x465   :  { %1827 = vmatpush3.bf16.xpose.msra.mxu1 %v2910_v54  ;;  %1413 = vmatprep.mubr.msk.f32.mxu1 %vm2206_vm0, %v2911_v3 }
 0x466   :  { %1828 = vmatprep.subr.bf16.mxu1 %v2891_v18  ;;  %1851 = vmatpush3.bf16.msra.mxu0 %v2910_v54  ;;  %v2916_v54 = vld [vmem:[#allocation41_spill] sm:$0xff] }
 0x467   :  { %1852 = vmatprep.subr.bf16.mxu0 %v2891_v18  ;;  %1448 = vmatprep.mubr.msk.f32.mxu0 %vm2206_vm0, %v2911_v3  ;;  %v2915_v3 = vld [vmem:[#allocation40_spill] sm:$0xff] }
 0x46a   :  { %1854 = vmatpush3.bf16.msra.mxu0 %v2912_v4 }
 0x46b   :  { %1855 = vmatprep.subr.bf16.mxu0 %v2891_v18 }
 0x46d   :  { %1830 = vmatpush3.bf16.xpose.msra.mxu1 %v2912_v4  ;;  %v2917_v4 = vld [vmem:[#allocation42_spill] sm:$0xff] }
 0x46e   :  { %1831 = vmatprep.subr.bf16.mxu1 %v2891_v18  ;;  %1857 = vmatpush3.bf16.msra.mxu0 %v2913_v30 }
 0x46f   :  { %1858 = vmatprep.subr.bf16.mxu0 %v2891_v18 }
 0x472   :  { %1860 = vmatpush3.bf16.msra.mxu0 %v2914_v27 }
 0x473   :  { %1861 = vmatprep.subr.bf16.mxu0 %v2891_v18 }
 0x475   :  { %1833 = vmatpush3.bf16.xpose.msra.mxu1 %v2913_v30  ;;  %v2919_v30 = vld [vmem:[#allocation13_spill] sm:$0xff] }
 0x476   :  { %1834 = vmatprep.subr.bf16.mxu1 %v2891_v18  ;;  %1863 = vmatpush3.bf16.msra.mxu0 %v2915_v3 }
 0x477   :  { %1864 = vmatprep.subr.bf16.mxu0 %v2891_v18 }
 0x47a   :  { %1866 = vmatpush3.bf16.msra.mxu0 %v2916_v54 }
 0x47b   :  { %1867 = vmatprep.subr.bf16.mxu0 %v2891_v18 }
 0x47d   :  { %1836 = vmatpush3.bf16.xpose.msra.mxu1 %v2914_v27  ;;  %v2920_v27 = vld [vmem:[#allocation14_spill] sm:$0xff] }
 0x47e   :  { %1837 = vmatprep.subr.bf16.mxu1 %v2891_v18  ;;  %1869 = vmatpush3.bf16.msra.mxu0 %v2917_v4 }
 0x47f   :  { %1870 = vmatprep.subr.bf16.mxu0 %v2891_v18 }
 0x482   :  { %1872 = vmatpush3.bf16.msra.mxu0 %v2918_v11 }
 0x483   :  { %1874 = vmatprep.subr.bf16.mxu0 %v2919_v30 }
 0x485   :  { %1839 = vmatpush3.bf16.xpose.msra.mxu1 %v2915_v3 }
 0x486   :  { %1840 = vmatprep.subr.bf16.mxu1 %v2891_v18 }
 0x48d   :  { %1842 = vmatpush3.bf16.xpose.msra.mxu1 %v2916_v54 }
 0x48e   :  { %1843 = vmatprep.subr.bf16.mxu1 %v2891_v18 }
 0x495   :  { %1845 = vmatpush3.bf16.xpose.msra.mxu1 %v2917_v4 }
 0x496   :  { %1846 = vmatprep.subr.bf16.mxu1 %v2891_v18 }
 0x49d   :  { %1848 = vmatpush3.bf16.xpose.msra.mxu1 %v2918_v11 }
 0x49e   :  { %1938 = vmatprep.subr.bf16.mxu1 %v2920_v27 }
 0x537   :  { %v620_v47 = vpop.f32.mrb[4].mxu1  ;;  %v691_v7 = vpop.f32.mrb[4].mxu0 }
 0x538   :  { %v621_v30 = vadd.f32 %v620_v47, %v2921_v5  ;;  %v622_v28 = vpop.f32.mrb[5].mxu1  ;;  %v693_v3 = vpop.f32.mrb[5].mxu0  ;;  %v692_v1 = vadd.f32 %v691_v7, %v2537_v0 }
 0x539   :  { %v623_v33 = vadd.f32 %v622_v28, %v2922_v35  ;;  %v694_v11 = vadd.f32 %v693_v3, %v2535_v42 }
 0x53a   :  { %v1205_v40 = vmul.f32 -1.442695, %v621_v30 }
 0x53b   :  { %v1206_v54 = vmul.f32 -1.442695, %v623_v33 }
 0x53c   :  { %2075 = vpow2.f32 %v1205_v40 }
 0x53d   :  { %2077 = vpow2.f32 %v1206_v54 }
 0x546   :  { %v2076_v53 = vpop.eup %2075 }
 0x547   :  { %v699_v4 = vadd.f32 1.0, %v2076_v53  ;;  %v2078_v25 = vpop.eup %2077 }
 0x548   :  { %v705_v17 = vadd.f32 1.0, %v2078_v25  ;;  %v2953_v25 = vld [vmem:[#allocation44_spill] sm:$0xff] }
 0x549   :  { %2079 = vrcp.f32 %v699_v4 }
 0x54a   :  { %2081 = vrcp.f32 %v705_v17 }
 0x553   :  { %v2080_v27 = vpop.eup %2079 }
 0x554   :  { %v708_v47 = vmul.f32 %v2080_v27, %v694_v11  ;;  %v2082_v30 = vpop.eup %2081 }
 0x555   :  { %v711_v63 = vsub.f32 1.0, %v2082_v30  ;;  %v713_v33 = vmul.f32 %v2082_v30, %v2541_v51 }
 0x556   :  { %v709_v5 = vadd.f32 %v708_v47, %v692_v1 }
 0x558   :  { %2083 = vtanh.f32 %v709_v5 }
 0x562   :  { %v2084_v28 = vpop.eup %2083 }
 0x563   :  { %v712_v40 = vmul.f32 %v2084_v28, %v711_v63 }
 0x565   :  { %v2655_v54 = vadd.f32 %v713_v33, %v712_v40 }
 0x567   :  { %1414 = vmatmul.mubr.f32.vlgmr.msra.gmra.mrb[6].mxu1 %v2655_v54 }
 0x568   :  { %1940 = vmatpush1.bf16.msra.mxu1 %v2293_v31 }
 0x569   :  { %1942 = vmatprep.subr.bf16.mxu1 %v2299_v36 }
 0x56c   :  { %1944 = vmatpush1.bf16.msra.mxu1 %v2306_v43 }
 0x56d   :  { %1946 = vmatprep.subr.bf16.mxu1 %v2308_v46 }
 0x570   :  { %1948 = vmatpush1.bf16.msra.mxu1 %v2317_v55 }
 0x571   :  { %1950 = vmatprep.subr.bf16.mxu1 %v2320_v58 }
 0x574   :  { %1952 = vmatpush1.bf16.msra.mxu1 %v2329_v6 }
 0x575   :  { %1954 = vmatprep.subr.bf16.mxu1 %v2332_v10 }
 0x578   :  { %1956 = vmatpush1.bf16.msra.mxu1 %v2341_v24  ;;  %v2923_v24 = vld [vmem:[#allocation15_spill] sm:$0xff] }
 0x579   :  { %1958 = vmatprep.subr.bf16.mxu1 %v2344_v26  ;;  %v2934_v26 = vld [vmem:[#allocation26_spill] sm:$0xff] }
 0x57c   :  { %1960 = vmatpush1.bf16.msra.mxu1 %v2353_v41  ;;  %v2935_v41 = vld [vmem:[#allocation27_spill] sm:$0xff] }
 0x57d   :  { %1962 = vmatprep.subr.bf16.mxu1 %v2356_v44  ;;  %v2936_v44 = vld [vmem:[#allocation28_spill] sm:$0xff] }
 0x580   :  { %1964 = vmatpush1.bf16.msra.mxu1 %v2365_v59  ;;  %v2937_v59 = vld [vmem:[#allocation29_spill] sm:$0xff] }
 0x581   :  { %1966 = vmatprep.subr.bf16.mxu1 %v2368_v61  ;;  %v2938_v61 = vld [vmem:[#allocation30_spill] sm:$0xff] }
 0x584   :  { %1968 = vmatpush1.bf16.msra.mxu1 %v2377_v19  ;;  %v2939_v19 = vld [vmem:[#allocation31_spill] sm:$0xff] }
 0x585   :  { %1970 = vmatprep.subr.bf16.mxu1 %v2380_v22  ;;  %v2940_v22 = vld [vmem:[#allocation32_spill] sm:$0xff] }
 0x588   :  { %1972 = vmatpush1.bf16.msra.mxu1 %v2389_v45  ;;  %v2941_v45 = vld [vmem:[#allocation33_spill] sm:$0xff] }
 0x589   :  { %1974 = vmatprep.subr.bf16.mxu1 %v2392_v48  ;;  %v2942_v48 = vld [vmem:[#allocation34_spill] sm:$0xff] }
 0x58c   :  { %1976 = vmatpush1.bf16.msra.mxu1 %v2401_v12 }
 0x58d   :  { %1978 = vmatprep.subr.bf16.mxu1 %v2404_v16 }
 0x590   :  { %1980 = vmatpush1.bf16.msra.mxu1 %v2413_v50  ;;  %v2944_v50 = vld [vmem:[#allocation36_spill] sm:$0xff] }
 0x591   :  { %1982 = vmatprep.subr.bf16.mxu1 %v2416_v56  ;;  %v2945_v56 = vmov 0.0  }
 0x594   :  { %1984 = vmatpush1.bf16.msra.mxu1 %v2425_v60  ;;  %v2943_v60 = vld [vmem:[#allocation35_spill] sm:$0xff] }
 0x595   :  { %1986 = vmatprep.subr.bf16.mxu1 %v2428_v29  ;;  %v2946_v29 = vld [vmem:[#allocation37_spill] sm:$0xff] }
 0x598   :  { %1988 = vmatpush1.bf16.msra.mxu1 %v2437_v57  ;;  %v2947_v57 = vld [vmem:[#allocation38_spill] sm:$0xff] }
 0x599   :  { %1990 = vmatprep.subr.bf16.mxu1 %v2440_v2  ;;  %v2948_v2 = vld [vmem:[#allocation39_spill] sm:$0xff] }
 0x59c   :  { %1992 = vmatpush1.bf16.msra.mxu1 %v2447_v21  ;;  %v2950_v21 = vld [vmem:[#allocation41_spill] sm:$0xff] }
 0x59d   :  { %1994 = vmatprep.subr.bf16.mxu1 %v2450_v37  ;;  %v2951_v37 = vld [vmem:[#allocation42_spill] sm:$0xff] }
 0x5a0   :  { %1996 = vmatpush1.bf16.msra.mxu1 %v2454_v39  ;;  %v2952_v39 = vld [vmem:[#allocation43_spill] sm:$0xff] }
 0x5a1   :  { %1998 = vmatprep.subr.bf16.mxu1 %v2458_v32 }
 0x5a4   :  { %2000 = vmatpush1.bf16.msra.mxu1 %v2462_v62  ;;  %v2949_v62 = vld [vmem:[#allocation40_spill] sm:$0xff] }
 0x5a5   :  { %2025 = vmatprep.subr.bf16.mxu1 %v2891_v18 }
 0x63a   :  { %v781_v31 = vpop.f32.mrb[6].mxu1 }
 0x63b   :  { %v782_v36 = vadd.f32 %v781_v31, %v2577_v13  ;;  %v1415_v43 = vpop.f32.mrb[7].mxu1 }
 0x63d   :  { %785 = vmax.xlane.f32.xlu1 %v782_v36 }
 0x6ca   :  { %v786_v46 = vpop.xlane.xlu1 %785 }
 0x6cb   :  { %v787_v55 = vsub.f32 %v782_v36, %v786_v46 }
 0x6cd   :  { %v788_v58 = vmul.f32 1.442695, %v787_v55 }
 0x6cf   :  { %2085 = vpow2.f32 %v788_v58 }
 0x6d9   :  { %v2086_v63 = vpop.eup %2085 }
 0x6da   :  { %790 = vadd.xlane.f32.xlu1 %v2086_v63 }
 0x767   :  { %v791_v1 = vpop.xlane.xlu1 %790 }
 0x768   :  { %v792_v6 = vadd.f32 1e-16, %v791_v1 }
 0x76a   :  { %2087 = vrcp.f32 %v792_v6 }
 0x774   :  { %v2088_v10 = vpop.eup %2087 }
 0x775   :  { %v794_v17 = vmul.f32 %v2088_v10, %v2086_v63 }
 0x777   :  { %1449 = vmatmul.mubr.f32.vlgmr.msra.gmra.mrb[6].mxu0 %v794_v17 }
 0x778   :  { %1876 = vmatpush1.bf16.msra.mxu0 %v2274_v8  ;;  %v2924_v8 = vld [vmem:[#allocation16_spill] sm:$0xff] }
 0x779   :  { %1878 = vmatprep.subr.bf16.mxu0 %v2276_v9  ;;  %v2925_v9 = vld [vmem:[#allocation17_spill] sm:$0xff] }
 0x77c   :  { %1880 = vmatpush1.bf16.msra.mxu0 %v2280_v14  ;;  %v2926_v14 = vld [vmem:[#allocation18_spill] sm:$0xff] }
 0x77d   :  { %1882 = vmatprep.subr.bf16.mxu0 %v2283_v15  ;;  %v2927_v15 = vld [vmem:[#allocation19_spill] sm:$0xff] }
 0x780   :  { %1884 = vmatpush1.bf16.msra.mxu0 %v2286_v20  ;;  %v2928_v20 = vld [vmem:[#allocation20_spill] sm:$0xff] }
 0x781   :  { %1886 = vmatprep.subr.bf16.mxu0 %v2289_v23  ;;  %v2929_v23 = vld [vmem:[#allocation21_spill] sm:$0xff] }
 0x784   :  { %1888 = vmatpush1.bf16.msra.mxu0 %v2296_v34  ;;  %v2930_v34 = vld [vmem:[#allocation22_spill] sm:$0xff] }
 0x785   :  { %1890 = vmatprep.subr.bf16.mxu0 %v2302_v38  ;;  %v2931_v38 = vld [vmem:[#allocation23_spill] sm:$0xff] }
 0x788   :  { %1892 = vmatpush1.bf16.msra.mxu0 %v2311_v49  ;;  %v2932_v49 = vld [vmem:[#allocation24_spill] sm:$0xff] }
 0x789   :  { %1894 = vmatprep.subr.bf16.mxu0 %v2314_v52  ;;  %v2933_v52 = vld [vmem:[#allocation25_spill] sm:$0xff] }
 0x78c   :  { %1896 = vmatpush1.bf16.msra.mxu0 %v2923_v24 }
 0x78d   :  { %1898 = vmatprep.subr.bf16.mxu0 %v2924_v8 }
 0x790   :  { %1900 = vmatpush1.bf16.msra.mxu0 %v2925_v9 }
 0x791   :  { %1902 = vmatprep.subr.bf16.mxu0 %v2926_v14 }
 0x794   :  { %1904 = vmatpush1.bf16.msra.mxu0 %v2927_v15 }
 0x795   :  { %1906 = vmatprep.subr.bf16.mxu0 %v2928_v20 }
 0x798   :  { %1908 = vmatpush1.bf16.msra.mxu0 %v2929_v23 }
 0x799   :  { %1910 = vmatprep.subr.bf16.mxu0 %v2930_v34 }
 0x79c   :  { %1912 = vmatpush1.bf16.msra.mxu0 %v2931_v38 }
 0x79d   :  { %1914 = vmatprep.subr.bf16.mxu0 %v2932_v49 }
 0x7a0   :  { %1916 = vmatpush1.bf16.msra.mxu0 %v2933_v52 }
 0x7a1   :  { %1918 = vmatprep.subr.bf16.mxu0 %v2934_v26 }
 0x7a4   :  { %1920 = vmatpush1.bf16.msra.mxu0 %v2935_v41 }
 0x7a5   :  { %1922 = vmatprep.subr.bf16.mxu0 %v2936_v44 }
 0x7a8   :  { %1924 = vmatpush1.bf16.msra.mxu0 %v2937_v59 }
 0x7a9   :  { %1926 = vmatprep.subr.bf16.mxu0 %v2938_v61 }
 0x7ac   :  { %1928 = vmatpush1.bf16.msra.mxu0 %v2939_v19 }
 0x7ad   :  { %1930 = vmatprep.subr.bf16.mxu0 %v2940_v22 }
 0x7b0   :  { %1932 = vmatpush1.bf16.msra.mxu0 %v2941_v45 }
 0x7b1   :  { %1934 = vmatprep.subr.bf16.mxu0 %v2942_v48 }
 0x7b4   :  { %1936 = vmatpush1.bf16.msra.mxu0 %v2943_v60 }
 0x7b5   :  { %2001 = vmatprep.subr.bf16.mxu0 %v2891_v18 }
 0x84a   :  { %v861_v12 = vpop.f32.mrb[6].mxu0 }
 0x84b   :  { %v1450_v16 = vpop.f32.mrb[7].mxu0  ;;  %933 = vmatprep.mubr.f32.mxu0 %v861_v12  ;;  %1004 = vmatprep.mubr.f32.mxu1 %v861_v12 }
 0x84c   :  { %934 = vmatmul.mubr.f32.vlgmr.msra.gmra.mrb[8].mxu0 %v2655_v54  ;;  %1005 = vmatmul.mubr.f32.vlgmr.msra.gmra.mrb[8].mxu1 %v2655_v54 }
 0x84d   :  { %2003 = vmatpush3.bf16.xpose.msra.mxu0 %v2944_v50  ;;  %1483 = vmatprep.mubr.msk.f32.mxu0 %vm2206_vm0, %v2945_v56 }
 0x84e   :  { %2004 = vmatprep.subr.bf16.mxu0 %v2891_v18  ;;  %2027 = vmatpush3.bf16.msra.mxu1 %v2944_v50 }
 0x84f   :  { %2028 = vmatprep.subr.bf16.mxu1 %v2891_v18  ;;  %1518 = vmatprep.mubr.msk.f32.mxu1 %vm2206_vm0, %v2945_v56 }
 0x852   :  { %2030 = vmatpush3.bf16.msra.mxu1 %v2946_v29 }
 0x853   :  { %2031 = vmatprep.subr.bf16.mxu1 %v2891_v18 }
 0x855   :  { %2006 = vmatpush3.bf16.xpose.msra.mxu0 %v2946_v29 }
 0x856   :  { %2007 = vmatprep.subr.bf16.mxu0 %v2891_v18  ;;  %2033 = vmatpush3.bf16.msra.mxu1 %v2947_v57 }
 0x857   :  { %2034 = vmatprep.subr.bf16.mxu1 %v2891_v18 }
 0x85a   :  { %2036 = vmatpush3.bf16.msra.mxu1 %v2948_v2 }
 0x85b   :  { %2037 = vmatprep.subr.bf16.mxu1 %v2891_v18 }
 0x85d   :  { %2009 = vmatpush3.bf16.xpose.msra.mxu0 %v2947_v57 }
 0x85e   :  { %2010 = vmatprep.subr.bf16.mxu0 %v2891_v18  ;;  %2039 = vmatpush3.bf16.msra.mxu1 %v2949_v62 }
 0x85f   :  { %2040 = vmatprep.subr.bf16.mxu1 %v2891_v18 }
 0x862   :  { %2042 = vmatpush3.bf16.msra.mxu1 %v2950_v21 }
 0x863   :  { %2043 = vmatprep.subr.bf16.mxu1 %v2891_v18 }
 0x865   :  { %2012 = vmatpush3.bf16.xpose.msra.mxu0 %v2948_v2 }
 0x866   :  { %2013 = vmatprep.subr.bf16.mxu0 %v2891_v18  ;;  %2045 = vmatpush3.bf16.msra.mxu1 %v2951_v37 }
 0x867   :  { %2046 = vmatprep.subr.bf16.mxu1 %v2891_v18 }
 0x86a   :  { %2048 = vmatpush3.bf16.msra.mxu1 %v2952_v39 }
 0x86d   :  { %2015 = vmatpush3.bf16.xpose.msra.mxu0 %v2949_v62 }
 0x86e   :  { %2016 = vmatprep.subr.bf16.mxu0 %v2891_v18 }
 0x875   :  { %2018 = vmatpush3.bf16.xpose.msra.mxu0 %v2950_v21 }
 0x876   :  { %2019 = vmatprep.subr.bf16.mxu0 %v2891_v18 }
 0x87d   :  { %2021 = vmatpush3.bf16.xpose.msra.mxu0 %v2951_v37 }
 0x87e   :  { %2022 = vmatprep.subr.bf16.mxu0 %v2891_v18 }
 0x885   :  { %2024 = vmatpush3.bf16.xpose.msra.mxu0 %v2952_v39 }
 0x91f   :  { %v935_v32 = vpop.f32.mrb[8].mxu0  ;;  %v1006_v51 = vpop.f32.mrb[8].mxu1 }
 0x920   :  { %v936_v53 = vadd.f32 %v935_v32, %v2953_v25  ;;  %v937_v11 = vpop.f32.mrb[9].mxu0  ;;  %v1008_v5 = vpop.f32.mrb[9].mxu1  ;;  %v1007_v33 = vadd.f32 %v1006_v51, %v2537_v0 }
 0x921   :  { %v938_v7 = vadd.f32 %v937_v11, %v2922_v35  ;;  %v1009_v18 = vadd.f32 %v1008_v5, %v2535_v42 }
 0x922   :  { %v1207_v3 = vmul.f32 -1.442695, %v936_v53 }
 0x923   :  { %v1208_v4 = vmul.f32 -1.442695, %v938_v7 }
 0x924   :  { %2089 = vpow2.f32 %v1207_v3 }
 0x925   :  { %2091 = vpow2.f32 %v1208_v4 }
 0x92e   :  { %v2090_v27 = vpop.eup %2089 }
 0x92f   :  { %v1014_v47 = vadd.f32 1.0, %v2090_v27  ;;  %v2092_v30 = vpop.eup %2091 }
 0x930   :  { %v1020_v28 = vadd.f32 1.0, %v2092_v30 }
 0x931   :  { %2093 = vrcp.f32 %v1014_v47 }
 0x932   :  { %2095 = vrcp.f32 %v1020_v28 }
 0x93b   :  { %v2094_v40 = vpop.eup %2093 }
 0x93c   :  { %v1023_v31 = vmul.f32 %v2094_v40, %v1009_v18  ;;  %v2096_v43 = vpop.eup %2095 }
 0x93d   :  { %v1026_v46 = vsub.f32 1.0, %v2096_v43  ;;  %v1028_v58 = vmul.f32 %v2096_v43, %v2655_v54 }
 0x93e   :  { %v1024_v36 = vadd.f32 %v1023_v31, %v1007_v33 }
 0x940   :  { %2097 = vtanh.f32 %v1024_v36 }
 0x94a   :  { %v2098_v35 = vpop.eup %2097 }
 0x94b   :  { %v1027_v55 = vmul.f32 %v2098_v35, %v1026_v46 }
 0x94d   :  { %v1029_v63 = vadd.f32 %v1028_v58, %v1027_v55 }
 0x94f   :  { %1484 = vmatmul.mubr.f32.vlgmr.msra.gmra.mrb[10].mxu0 %v1029_v63  ;;  %1184 = vst [vmem:[#allocation9] sm:$0xff] %v1029_v63 }
 0xa22   :  { %v1096_v1 = vpop.f32.mrb[10].mxu0 }
 0xa23   :  { %v1097_v6 = vadd.f32 %v1096_v1, %v2577_v13  ;;  %v1485_v42 = vpop.f32.mrb[11].mxu0 }
 0xa25   :  { %1100 = vmax.xlane.f32.xlu0 %v1097_v6 }
 0xab2   :  { %v1101_v10 = vpop.xlane.xlu0 %1100 }
 0xab3   :  { %v1102_v0 = vsub.f32 %v1097_v6, %v1101_v10 }
 0xab5   :  { %v1103_v17 = vmul.f32 1.442695, %v1102_v0 }
 0xab7   :  { %2099 = vpow2.f32 %v1103_v17 }
 0xac1   :  { %v2100_v24 = vpop.eup %2099 }
 0xac2   :  { %1105 = vadd.xlane.f32.xlu1 %v2100_v24 }
 0xb4f   :  { %v1106_v8 = vpop.xlane.xlu1 %1105 }
 0xb50   :  { %v1107_v9 = vadd.f32 1e-16, %v1106_v8 }
 0xb52   :  { %2101 = vrcp.f32 %v1107_v9 }
 0xb5c   :  { %v2102_v14 = vpop.eup %2101 }
 0xb5d   :  { %v1109_v15 = vmul.f32 %v2102_v14, %v2100_v24 }
 0xb5f   :  { %1519 = vmatmul.mubr.f32.vlgmr.msra.gmra.mrb[10].mxu1 %v1109_v15 }
 0xc32   :  { %v1176_v54 = vpop.f32.mrb[10].mxu1 }
 0xc33   :  { %1185 = vst [vmem:[#allocation9 + $0x8] sm:$0xff] %v1176_v54  ;;  %v1520_v13 = vpop.f32.mrb[11].mxu1 }
 0xc34   :  { %2180 = shalt.err (!%p2177_p0)
}
 0xc35   :  { %s2181_s7 = scalar_lea.hbm %s2781_s4, 256 }
 0xc36   :  { %p2182_p1 = scmp.ne.s32.totalorder %s2781_s4, %s2181_s7  ;;  %p2185_p2 = scmp.lt.u32.totalorder %s2181_s7, %s2781_s4 }
 0xc38   :  { %p2187_p3 = pnand %p2185_p2, %p2182_p1 }
 0xc3a   :  { %2190 = shalt.err (!%p2187_p3)
}
 0xc3b   :  { %1195 = dma.vmem_to_hbm [thread:$0]  %s1193_s29, 256, %s2781_s4, [#allocation5]  }
 0xc3c   :  { %2195 = dma.done.wait [#allocation5], 256  }
 0xc3d   :  { %2196 = vsyncadd [#allocation5], 4294967040 }
 0xc3e   :  { %1199 = vsyncpa [#allocation4], 1 }
 0xc3f   :  { %1200 = vsyncpa [#allocation7], 1 }
 0xc40   :  { %1201 = vsyncpa [#allocation5], 1 }

</bundles_post_ra>
